<compile_context>
chip_gen: v7x
topology: tpu7x:2x2x1
jax: 0.10.0
libtpu: 0.0.40
codegen_flags: <defaults>
</compile_context>

<pallas_src>
import functools

import jax
import jax.numpy as jnp
from jax.experimental import pallas as pl
from jax.experimental.pallas import tpu as pltpu

EPS = 1e-5
# tap order t = dh*3 + dw  <->  (di, dj) = (dh-1, dw-1); matches the weight layouts below
_TAPS = tuple((dh - 1, dw - 1) for dh in range(3) for dw in range(3))


# ----------------------------- in-kernel helpers -----------------------------

def _conv3x3_accum(x_f32, w9_ref, row, col, ho, wo, acc):
    """Accumulate a stride-1 3x3 conv (zero pad = 1) into `acc`, taps built in-kernel.

    x_f32 : (C, TM) f32 value; TM = whole images flattened (lane-dense n*ho*wo).
    w9_ref: (9, Cout, C) bf16 ref, tap-major, BN already folded in.
    row/col: (1, TM) int32 spatial coordinates of each lane within its image.
    acc   : (Cout, TM) f32 accumulator.
    """
    tm = x_f32.shape[-1]
    for t, (di, dj) in enumerate(_TAPS):
        off = di * wo + dj                      # lane offset of the tap's source pixel
        if off == 0:
            shifted = x_f32
        else:
            # want out[m] = x[m + off]; jnp.roll semantics => shift = -off (kept >= 0)
            shifted = pltpu.roll(x_f32, (-off) % tm, 1)
        valid = ((row + di >= 0) & (row + di < ho) &
                 (col + dj >= 0) & (col + dj < wo))          # also kills cross-image bleed
        tap = jnp.where(valid, shifted, 0.0).astype(jnp.bfloat16)
        acc = acc + jnp.dot(w9_ref[t], tap, preferred_element_type=jnp.float32)
    return acc


def _resblock_s1_kernel(row_ref, col_ref, x_ref, w1_ref, b1_ref, w2_ref, b2_ref,
                        *rest, ho, wo, increase):
    """Whole ResBlock, both convs stride 1.  x: (Cin, TM) bf16 -> out: (Cout, TM)."""
    if increase:
        ws_ref, o_ref = rest
    else:
        (o_ref,) = rest
    cout, tm = o_ref.shape
    row = row_ref[...]
    col = col_ref[...]
    x = x_ref[...]                                   # (Cin, TM) bf16, read ONCE from HBM
    xf = x.astype(jnp.float32)

    zero = jnp.zeros((cout, tm), jnp.float32)
    # conv1 + BN1(folded) + ReLU  (taps generated in-kernel)
    acc1 = _conv3x3_accum(xf, w1_ref, row, col, ho, wo, zero) + b1_ref[...]
    a1 = jnp.maximum(acc1, 0.0)                      # staged on-chip, never hits HBM

    # conv2 + BN2(folded)  (taps generated in-kernel)
    acc2 = _conv3x3_accum(a1, w2_ref, row, col, ho, wo, zero) + b2_ref[...]
    if increase:
        # fused 1x1 projection shortcut (its bias is pre-folded into b2)
        acc2 = acc2 + jnp.dot(ws_ref[...], x, preferred_element_type=jnp.float32)
    else:
        # identity shortcut
        acc2 = acc2 + xf
    o_ref[...] = jnp.maximum(acc2, 0.0).astype(o_ref.dtype)


def _resblock_strided_kernel(row_ref, col_ref, p1_ref, xs_ref, w1_ref, b1_ref,
                             w2_ref, b2_ref, ws_ref, o_ref, *, ho, wo):
    """Whole ResBlock with strided conv1 (wrapper-built patches) + fused 1x1 shortcut."""
    cout, tm = o_ref.shape
    row = row_ref[...]
    col = col_ref[...]

    # conv1 (stride s) + BN1 + ReLU: one MXU pass over the im2col patches, K = 9*Cin
    acc1 = (jnp.dot(w1_ref[...], p1_ref[...], preferred_element_type=jnp.float32)
            + b1_ref[...])
    a1 = jnp.maximum(acc1, 0.0)                      # staged on-chip

    # conv2 (stride 1) + BN2, taps generated in-kernel
    zero = jnp.zeros((cout, tm), jnp.float32)
    acc2 = _conv3x3_accum(a1, w2_ref, row, col, ho, wo, zero) + b2_ref[...]

    # 1x1 projection shortcut fused into the same accumulation (bias folded into b2)
    acc2 = acc2 + jnp.dot(ws_ref[...], xs_ref[...], preferred_element_type=jnp.float32)
    o_ref[...] = jnp.maximum(acc2, 0.0).astype(o_ref.dtype)


# ------------------------------ wrapper helpers ------------------------------

def _pick_tile_lanes(n, ho, wo, cin, cout, vmem_budget=8 * 1024 * 1024):
    """Lane tile = whole images; lane-dense (multiple of 128) when possible; when the
    batch allows, keep >= 2 grid steps so v7x can shard the parallel axis over 2 TCs."""
    hw = ho * wo
    # rough per-lane VMEM bytes: bf16 x (double-buffered) + f32 acc1/a1/acc2 + out
    per_lane = 4 * cin + 12 * cout + 16
    max_lanes = max(hw, (vmem_budget // per_lane) // 128 * 128)
    cands = [g for g in range(1, n + 1) if n % g == 0 and g * hw <= max_lanes]
    if not cands:
        cands = [1]
    dense = [g for g in cands if (g * hw) % 128 == 0]
    if dense:
        multi = [g for g in dense if n // g >= 2]
        g = max(multi) if multi else max(dense)
    else:
        g = max(cands)   # TODO(synk): sub-128 lane tiles fall back to masked stores
    return g * hw


def _lane_coords(tm, ho, wo):
    """(row, col) int32 coordinates of each lane within its image, shape (1, tm)."""
    lane = jnp.arange(tm, dtype=jnp.int32)
    hw = lane % (ho * wo)
    row = (hw // wo).reshape(1, tm)
    col = (hw % wo).reshape(1, tm)
    return row, col


def _im2col_3x3(x4, stride):
    """x4: (C, N, H, W) f32 -> (9*C, N*Ho*Wo) bf16, taps outer / channels inner.
    Only used for the strided conv1 of the first block (see TODO)."""
    c, n, h, w = x4.shape
    ho = (h - 1) // stride + 1
    wo = (w - 1) // stride + 1
    xp = jnp.pad(x4.astype(jnp.bfloat16), ((0, 0), (0, 0), (1, 1), (1, 1)))
    cols = []
    for dh in range(3):
        for dw in range(3):
            cols.append(xp[:, :,
                           dh:dh + (ho - 1) * stride + 1:stride,
                           dw:dw + (wo - 1) * stride + 1:stride])
    return jnp.concatenate(cols, axis=0).reshape(9 * c, n * ho * wo)


# ------------------------------ pallas_call wrappers -------------------------

_COMPILER_PARAMS = pltpu.CompilerParams(
    dimension_semantics=("parallel",),
    vmem_limit_bytes=32 * 1024 * 1024,   # safe on v5e/v6e (128 MiB) and v7x (64 MiB)
)


def resblock_s1(xflat, p, n, ho, wo, out_dtype):
    """Fused stride-1 ResBlock.  xflat: (Cin, M) bf16, M = n*ho*wo lane-dense."""
    cin, m = xflat.shape
    cout = p["cout"]
    tm = _pick_tile_lanes(n, ho, wo, cin, cout)
    row, col = _lane_coords(tm, ho, wo)

    kernel = functools.partial(_resblock_s1_kernel, ho=ho, wo=wo,
                               increase=p["increase"])
    in_specs = [
        pl.BlockSpec((1, tm), lambda i: (0, 0)),              # row coords (resident)
        pl.BlockSpec((1, tm), lambda i: (0, 0)),              # col coords (resident)
        pl.BlockSpec((cin, tm), lambda i: (0, i)),            # x tile (streamed)
        pl.BlockSpec((9, cout, cin), lambda i: (0, 0, 0)),    # w1 (resident)
        pl.BlockSpec((cout, 1), lambda i: (0, 0)),            # b1
        pl.BlockSpec((9, cout, cout), lambda i: (0, 0, 0)),   # w2 (resident)
        pl.BlockSpec((cout, 1), lambda i: (0, 0)),            # b2 (+ shortcut bias)
    ]
    args = [row, col, xflat, p["w1"], p["b1"], p["w2"], p["b2"]]
    if p["increase"]:
        in_specs.append(pl.BlockSpec((cout, cin), lambda i: (0, 0)))   # ws (resident)
        args.append(p["ws"])

    flops = 2 * m * cout * (9 * cin + 9 * cout + (cin if p["increase"] else 0))
    bytes_accessed = (xflat.size * 2
                      + m * cout * jnp.dtype(out_dtype).itemsize
                      + 9 * cout * (cin + cout) * 2
                      + 2 * cout * 4 + 2 * tm * 4)

    return pl.pallas_call(
        kernel,
        out_shape=jax.ShapeDtypeStruct((cout, m), out_dtype),
        grid=(m // tm,),
        in_specs=in_specs,
        out_specs=pl.BlockSpec((cout, tm), lambda i: (0, i)),
        compiler_params=_COMPILER_PARAMS,
        cost_estimate=pl.CostEstimate(flops=flops, transcendentals=0,
                                      bytes_accessed=bytes_accessed),
    )(*args)


def resblock_strided(x4, p, out_dtype):
    """Fused first (downsampling) ResBlock.  x4: (Cin, N, H, W) f32."""
    cin, n, h, w = x4.shape
    s = p["stride"]
    cout = p["cout"]
    ho = (h - 1) // s + 1
    wo = (w - 1) // s + 1
    m = n * ho * wo

    # TODO(synk): wrapper-side patches / strided shortcut gather (first block only).
    patches1 = _im2col_3x3(x4, s)                                   # (9*Cin, M) bf16
    xs = x4[:, :, ::s, ::s].reshape(cin, m).astype(jnp.bfloat16)    # 1x1-shortcut input

    tm = _pick_tile_lanes(n, ho, wo, cin, cout)
    row, col = _lane_coords(tm, ho, wo)

    kernel = functools.partial(_resblock_strided_kernel, ho=ho, wo=wo)
    in_specs = [
        pl.BlockSpec((1, tm), lambda i: (0, 0)),              # row coords (resident)
        pl.BlockSpec((1, tm), lambda i: (0, 0)),              # col coords (resident)
        pl.BlockSpec((9 * cin, tm), lambda i: (0, i)),        # conv1 patches (streamed)
        pl.BlockSpec((cin, tm), lambda i: (0, i)),            # shortcut input (streamed)
        pl.BlockSpec((cout, 9 * cin), lambda i: (0, 0)),      # w1 (resident)
        pl.BlockSpec((cout, 1), lambda i: (0, 0)),            # b1
        pl.BlockSpec((9, cout, cout), lambda i: (0, 0, 0)),   # w2 (resident)
        pl.BlockSpec((cout, 1), lambda i: (0, 0)),            # b2 + shortcut bias
        pl.BlockSpec((cout, cin), lambda i: (0, 0)),          # ws (resident)
    ]
    args = [row, col, patches1, xs, p["w1"], p["b1"], p["w2"], p["b2"], p["ws"]]

    flops = 2 * m * cout * (9 * cin + 9 * cout + cin)
    bytes_accessed = (patches1.size * 2 + xs.size * 2
                      + m * cout * jnp.dtype(out_dtype).itemsize
                      + (9 * cout * cin + 9 * cout * cout + cout * cin) * 2
                      + 2 * cout * 4 + 2 * tm * 4)

    out = pl.pallas_call(
        kernel,
        out_shape=jax.ShapeDtypeStruct((cout, m), out_dtype),
        grid=(m // tm,),
        in_specs=in_specs,
        out_specs=pl.BlockSpec((cout, tm), lambda i: (0, i)),
        compiler_params=_COMPILER_PARAMS,
        cost_estimate=pl.CostEstimate(flops=flops, transcendentals=0,
                                      bytes_accessed=bytes_accessed),
    )(*args)
    return out, (ho, wo)


# ------------------------------- parameters ---------------------------------

def _make_bn(key, c):
    k1, k2, k3, k4 = jax.random.split(key, 4)
    gamma = jax.random.uniform(k1, (c,), jnp.float32, 0.5, 1.5)
    beta = 0.1 * jax.random.normal(k2, (c,), jnp.float32)
    mean = 0.1 * jax.random.normal(k3, (c,), jnp.float32)
    var = jax.random.uniform(k4, (c,), jnp.float32, 0.5, 1.5)
    return gamma, beta, mean, var


def _make_conv(key, cin, cout, k):
    k1, k2 = jax.random.split(key)
    fan = cin * k * k
    w = jax.random.normal(k1, (cout, cin, k, k), jnp.float32) / jnp.sqrt(fan)
    b = 0.01 * jax.random.normal(k2, (cout,), jnp.float32)
    return w, b


def _fold_bn(w, b, gamma, beta, mean, var):
    # BN(conv(x)) = (scale*W) x + (scale*b + beta - scale*mean)   (inference stats)
    scale = gamma / jnp.sqrt(var + EPS)
    return w * scale[:, None, None, None], scale * b + beta - scale * mean


def init_block(key, cin, cout, stride):
    keys = jax.random.split(key, 5)
    w1, b1 = _make_conv(keys[0], cin, cout, 3)
    w2, b2 = _make_conv(keys[2], cout, cout, 3)
    w1f, b1f = _fold_bn(w1, b1, *_make_bn(keys[1], cout))
    w2f, b2f = _fold_bn(w2, b2, *_make_bn(keys[3], cout))
    increase = cin != cout
    if stride != 1 and not increase:
        # Mirrors the PyTorch module: no projection and x + y would shape-mismatch.
        raise ValueError("stride > 1 requires in_channels != out_channels")

    p = {"stride": stride, "cin": cin, "cout": cout, "increase": increase,
         "b1": b1f.reshape(cout, 1),
         # conv2 taps are always generated in-kernel -> (9, Cout, Cout), tap-major
         "w2": w2f.transpose(2, 3, 0, 1).reshape(9, cout, cout).astype(jnp.bfloat16)}
    if stride != 1:
        # conv1 consumed as one (Cout, 9*Cin) matmul over wrapper-built patches
        p["w1"] = w1f.transpose(0, 2, 3, 1).reshape(cout, 9 * cin).astype(jnp.bfloat16)
    else:
        # conv1 taps generated in-kernel
        p["w1"] = w1f.transpose(2, 3, 0, 1).reshape(9, cout, cin).astype(jnp.bfloat16)

    b2_total = b2f
    if increase:
        ws, bs = _make_conv(keys[4], cin, cout, 1)
        p["ws"] = ws[:, :, 0, 0].astype(jnp.bfloat16)
        b2_total = b2f + bs               # shortcut bias folded into the conv2 bias
    p["b2"] = b2_total.reshape(cout, 1)
    return p


# -------------------------------- forward -----------------------------------

def model_forward(x_nchw, blocks):
    n = x_nchw.shape[0]
    x4 = jnp.transpose(x_nchw, (1, 0, 2, 3))        # NCHW -> (C, N, H, W)
    last = len(blocks) - 1

    p0 = blocks[0]
    dt0 = jnp.float32 if last == 0 else jnp.bfloat16
    if p0["stride"] != 1:
        y, (ho, wo) = resblock_strided(x4, p0, dt0)
    else:
        c, _, h, w = x4.shape
        ho, wo = h, w
        y = resblock_s1(x4.reshape(c, n * h * w).astype(jnp.bfloat16),
                        p0, n, ho, wo, dt0)

    # ResNBlocks appends only stride-1, cin==cout blocks after the first one.
    for idx in range(1, len(blocks)):
        dt = jnp.float32 if idx == last else jnp.bfloat16
        y = resblock_s1(y, blocks[idx], n, ho, wo, dt)

    cout = blocks[-1]["cout"]
    y = y.reshape(cout, n, ho, wo).astype(jnp.float32)
    return jnp.transpose(y, (1, 0, 2, 3))            # back to NCHW


# ---------------------------------- main -------------------------------------

if __name__ == "__main__":
    in_channels, out_channels, num, stride = 4, 16, 2, 2
    key = jax.random.PRNGKey(0)
    kx, kp = jax.random.split(key)
    x = jax.random.normal(kx, (2, in_channels, 16, 16), jnp.float32)  # NCHW like PyTorch

    bkeys = jax.random.split(kp, num)
    blocks = [init_block(bkeys[0], in_channels, out_channels, stride)]
    for i in range(1, num):
        blocks.append(init_block(bkeys[i], out_channels, out_channels, 1))

    fwd = jax.jit(lambda xx: model_forward(xx, blocks))
    out = jax.block_until_ready(fwd(x))
    assert out.shape == (2, out_channels, 16 // stride, 16 // stride), out.shape
    assert bool(jnp.all(jnp.isfinite(out)))
    print("KERNEL_OK")
</pallas_src>

<mosaic_0001>
module attributes {stable_mosaic.version = 11 : i64} {
  func.func @_resblock_strided_kernel(%arg0: i32, %arg1: memref<1x128xi32, #tpu.memory_space<vmem>>, %arg2: memref<1x128xi32, #tpu.memory_space<vmem>>, %arg3: memref<36x128xbf16, #tpu.memory_space<vmem>>, %arg4: memref<4x128xbf16, #tpu.memory_space<vmem>>, %arg5: memref<16x36xbf16, #tpu.memory_space<vmem>>, %arg6: memref<16x1xf32, #tpu.memory_space<vmem>>, %arg7: memref<9x16x16xbf16, #tpu.memory_space<vmem>>, %arg8: memref<16x1xf32, #tpu.memory_space<vmem>>, %arg9: memref<16x4xbf16, #tpu.memory_space<vmem>>, %arg10: memref<16x128xbf16, #tpu.memory_space<vmem>>) attributes {dimension_semantics = [#tpu.dimension_semantics<parallel>], iteration_bounds = array<i64: 1>, scalar_prefetch = 0 : i64, scratch_operands = 0 : i64, tpu.core_type = #tpu.core_type<tc>, window_params = [{pipeline_mode = #tpu.pipeline_mode<synchronous>, transform_indices = @transform_0, window_bounds = array<i64: 1, 128>}, {pipeline_mode = #tpu.pipeline_mode<synchronous>, transform_indices = @transform_1, window_bounds = array<i64: 1, 128>}, {transform_indices = @transform_2, window_bounds = array<i64: 36, 128>}, {transform_indices = @transform_3, window_bounds = array<i64: 4, 128>}, {pipeline_mode = #tpu.pipeline_mode<synchronous>, transform_indices = @transform_4, window_bounds = array<i64: 16, 36>}, {pipeline_mode = #tpu.pipeline_mode<synchronous>, transform_indices = @transform_5, window_bounds = array<i64: 16, 1>}, {pipeline_mode = #tpu.pipeline_mode<synchronous>, transform_indices = @transform_6, window_bounds = array<i64: 9, 16, 16>}, {pipeline_mode = #tpu.pipeline_mode<synchronous>, transform_indices = @transform_7, window_bounds = array<i64: 16, 1>}, {pipeline_mode = #tpu.pipeline_mode<synchronous>, transform_indices = @transform_8, window_bounds = array<i64: 16, 4>}, {transform_indices = @transform_9, window_bounds = array<i64: 16, 128>}]} {
    %c0 = arith.constant 0 : index
    %c0_0 = arith.constant 0 : index
    %0 = vector.load %arg1[%c0, %c0_0] : memref<1x128xi32, #tpu.memory_space<vmem>>, vector<1x128xi32>
    %c0_1 = arith.constant 0 : index
    %c0_2 = arith.constant 0 : index
    %1 = vector.load %arg2[%c0_1, %c0_2] : memref<1x128xi32, #tpu.memory_space<vmem>>, vector<1x128xi32>
    %c0_3 = arith.constant 0 : index
    %c0_4 = arith.constant 0 : index
    %2 = vector.load %arg5[%c0_3, %c0_4] : memref<16x36xbf16, #tpu.memory_space<vmem>>, vector<16x36xbf16>
    %c0_5 = arith.constant 0 : index
    %c0_6 = arith.constant 0 : index
    %3 = vector.load %arg3[%c0_5, %c0_6] : memref<36x128xbf16, #tpu.memory_space<vmem>>, vector<36x128xbf16>
    %cst = arith.constant dense<0.000000e+00> : vector<16x128xf32>
    %4 = tpu.matmul %2, %3, %cst {dimension_numbers = #tpu.dot_dimension_numbers<[1], [0], [0], [1], [0, 0, 1, 1], [], []>} : vector<16x36xbf16>, vector<36x128xbf16>, vector<16x128xf32> -> vector<16x128xf32>
    %c0_7 = arith.constant 0 : index
    %c0_8 = arith.constant 0 : index
    %5 = vector.load %arg6[%c0_7, %c0_8] : memref<16x1xf32, #tpu.memory_space<vmem>>, vector<16x1xf32>
    %6 = vector.broadcast %5 : vector<16x1xf32> to vector<16x128xf32>
    %7 = arith.addf %4, %6 : vector<16x128xf32>
    %cst_9 = arith.constant 0.000000e+00 : f32
    %8 = vector.broadcast %cst_9 : f32 to vector<16x128xf32>
    %9 = arith.maximumf %7, %8 : vector<16x128xf32>
    %cst_10 = arith.constant 0.000000e+00 : f32
    %10 = vector.broadcast %cst_10 : f32 to vector<16x128xf32>
    %c9_i32 = arith.constant 9 : i32
    %11 = tpu.dynamic_rotate %9 by %c9_i32 dim 1 : vector<16x128xf32>, i32 -> vector<16x128xf32>
    %c-1_i32 = arith.constant -1 : i32
    %12 = vector.broadcast %c-1_i32 : i32 to vector<1x128xi32>
    %13 = arith.addi %0, %12 : vector<1x128xi32>
    %c0_i32 = arith.constant 0 : i32
    %14 = vector.broadcast %c0_i32 : i32 to vector<1x128xi32>
    %15 = arith.cmpi sge, %13, %14 : vector<1x128xi32>
    %c-1_i32_11 = arith.constant -1 : i32
    %16 = vector.broadcast %c-1_i32_11 : i32 to vector<1x128xi32>
    %17 = arith.addi %0, %16 : vector<1x128xi32>
    %c8_i32 = arith.constant 8 : i32
    %18 = vector.broadcast %c8_i32 : i32 to vector<1x128xi32>
    %19 = arith.cmpi slt, %17, %18 : vector<1x128xi32>
    %20 = arith.andi %15, %19 : vector<1x128xi1>
    %c-1_i32_12 = arith.constant -1 : i32
    %21 = vector.broadcast %c-1_i32_12 : i32 to vector<1x128xi32>
    %22 = arith.addi %1, %21 : vector<1x128xi32>
    %c0_i32_13 = arith.constant 0 : i32
    %23 = vector.broadcast %c0_i32_13 : i32 to vector<1x128xi32>
    %24 = arith.cmpi sge, %22, %23 : vector<1x128xi32>
    %25 = arith.andi %20, %24 : vector<1x128xi1>
    %c-1_i32_14 = arith.constant -1 : i32
    %26 = vector.broadcast %c-1_i32_14 : i32 to vector<1x128xi32>
    %27 = arith.addi %1, %26 : vector<1x128xi32>
    %c8_i32_15 = arith.constant 8 : i32
    %28 = vector.broadcast %c8_i32_15 : i32 to vector<1x128xi32>
    %29 = arith.cmpi slt, %27, %28 : vector<1x128xi32>
    %30 = arith.andi %25, %29 : vector<1x128xi1>
    %cst_16 = arith.constant 0.000000e+00 : f32
    %31 = vector.shape_cast %30 : vector<1x128xi1> to vector<1x128xi1>
    %32 = vector.broadcast %31 : vector<1x128xi1> to vector<16x128xi1>
    %33 = vector.broadcast %cst_16 : f32 to vector<16x128xf32>
    %34 = arith.select %32, %11, %33 : vector<16x128xi1>, vector<16x128xf32>
    %35 = arith.truncf %34 : vector<16x128xf32> to vector<16x128xbf16>
    %c0_17 = arith.constant 0 : index
    %c0_18 = arith.constant 0 : index
    %c0_19 = arith.constant 0 : index
    %36 = vector.load %arg7[%c0_17, %c0_18, %c0_19] : memref<9x16x16xbf16, #tpu.memory_space<vmem>>, vector<1x16x16xbf16>
    %37 = vector.shape_cast %36 : vector<1x16x16xbf16> to vector<16x16xbf16>
    %cst_20 = arith.constant dense<0.000000e+00> : vector<16x128xf32>
    %38 = tpu.matmul %37, %35, %cst_20 {dimension_numbers = #tpu.dot_dimension_numbers<[1], [0], [0], [1], [0, 0, 1, 1], [], []>} : vector<16x16xbf16>, vector<16x128xbf16>, vector<16x128xf32> -> vector<16x128xf32>
    %39 = arith.addf %10, %38 : vector<16x128xf32>
    %c8_i32_21 = arith.constant 8 : i32
    %40 = tpu.dynamic_rotate %9 by %c8_i32_21 dim 1 : vector<16x128xf32>, i32 -> vector<16x128xf32>
    %c-1_i32_22 = arith.constant -1 : i32
    %41 = vector.broadcast %c-1_i32_22 : i32 to vector<1x128xi32>
    %42 = arith.addi %0, %41 : vector<1x128xi32>
    %c0_i32_23 = arith.constant 0 : i32
    %43 = vector.broadcast %c0_i32_23 : i32 to vector<1x128xi32>
    %44 = arith.cmpi sge, %42, %43 : vector<1x128xi32>
    %c-1_i32_24 = arith.constant -1 : i32
    %45 = vector.broadcast %c-1_i32_24 : i32 to vector<1x128xi32>
    %46 = arith.addi %0, %45 : vector<1x128xi32>
    %c8_i32_25 = arith.constant 8 : i32
    %47 = vector.broadcast %c8_i32_25 : i32 to vector<1x128xi32>
    %48 = arith.cmpi slt, %46, %47 : vector<1x128xi32>
    %49 = arith.andi %44, %48 : vector<1x128xi1>
    %c0_i32_26 = arith.constant 0 : i32
    %50 = vector.broadcast %c0_i32_26 : i32 to vector<1x128xi32>
    %51 = arith.addi %1, %50 : vector<1x128xi32>
    %c0_i32_27 = arith.constant 0 : i32
    %52 = vector.broadcast %c0_i32_27 : i32 to vector<1x128xi32>
    %53 = arith.cmpi sge, %51, %52 : vector<1x128xi32>
    %54 = arith.andi %49, %53 : vector<1x128xi1>
    %c0_i32_28 = arith.constant 0 : i32
    %55 = vector.broadcast %c0_i32_28 : i32 to vector<1x128xi32>
    %56 = arith.addi %1, %55 : vector<1x128xi32>
    %c8_i32_29 = arith.constant 8 : i32
    %57 = vector.broadcast %c8_i32_29 : i32 to vector<1x128xi32>
    %58 = arith.cmpi slt, %56, %57 : vector<1x128xi32>
    %59 = arith.andi %54, %58 : vector<1x128xi1>
    %cst_30 = arith.constant 0.000000e+00 : f32
    %60 = vector.shape_cast %59 : vector<1x128xi1> to vector<1x128xi1>
    %61 = vector.broadcast %60 : vector<1x128xi1> to vector<16x128xi1>
    %62 = vector.broadcast %cst_30 : f32 to vector<16x128xf32>
    %63 = arith.select %61, %40, %62 : vector<16x128xi1>, vector<16x128xf32>
    %64 = arith.truncf %63 : vector<16x128xf32> to vector<16x128xbf16>
    %c1 = arith.constant 1 : index
    %c0_31 = arith.constant 0 : index
    %c0_32 = arith.constant 0 : index
    %65 = vector.load %arg7[%c1, %c0_31, %c0_32] : memref<9x16x16xbf16, #tpu.memory_space<vmem>>, vector<1x16x16xbf16>
    %66 = vector.shape_cast %65 : vector<1x16x16xbf16> to vector<16x16xbf16>
    %cst_33 = arith.constant dense<0.000000e+00> : vector<16x128xf32>
    %67 = tpu.matmul %66, %64, %cst_33 {dimension_numbers = #tpu.dot_dimension_numbers<[1], [0], [0], [1], [0, 0, 1, 1], [], []>} : vector<16x16xbf16>, vector<16x128xbf16>, vector<16x128xf32> -> vector<16x128xf32>
    %68 = arith.addf %39, %67 : vector<16x128xf32>
    %c7_i32 = arith.constant 7 : i32
    %69 = tpu.dynamic_rotate %9 by %c7_i32 dim 1 : vector<16x128xf32>, i32 -> vector<16x128xf32>
    %c-1_i32_34 = arith.constant -1 : i32
    %70 = vector.broadcast %c-1_i32_34 : i32 to vector<1x128xi32>
    %71 = arith.addi %0, %70 : vector<1x128xi32>
    %c0_i32_35 = arith.constant 0 : i32
    %72 = vector.broadcast %c0_i32_35 : i32 to vector<1x128xi32>
    %73 = arith.cmpi sge, %71, %72 : vector<1x128xi32>
    %c-1_i32_36 = arith.constant -1 : i32
    %74 = vector.broadcast %c-1_i32_36 : i32 to vector<1x128xi32>
    %75 = arith.addi %0, %74 : vector<1x128xi32>
    %c8_i32_37 = arith.constant 8 : i32
    %76 = vector.broadcast %c8_i32_37 : i32 to vector<1x128xi32>
    %77 = arith.cmpi slt, %75, %76 : vector<1x128xi32>
    %78 = arith.andi %73, %77 : vector<1x128xi1>
    %c1_i32 = arith.constant 1 : i32
    %79 = vector.broadcast %c1_i32 : i32 to vector<1x128xi32>
    %80 = arith.addi %1, %79 : vector<1x128xi32>
    %c0_i32_38 = arith.constant 0 : i32
    %81 = vector.broadcast %c0_i32_38 : i32 to vector<1x128xi32>
    %82 = arith.cmpi sge, %80, %81 : vector<1x128xi32>
    %83 = arith.andi %78, %82 : vector<1x128xi1>
    %c1_i32_39 = arith.constant 1 : i32
    %84 = vector.broadcast %c1_i32_39 : i32 to vector<1x128xi32>
    %85 = arith.addi %1, %84 : vector<1x128xi32>
    %c8_i32_40 = arith.constant 8 : i32
    %86 = vector.broadcast %c8_i32_40 : i32 to vector<1x128xi32>
    %87 = arith.cmpi slt, %85, %86 : vector<1x128xi32>
    %88 = arith.andi %83, %87 : vector<1x128xi1>
    %cst_41 = arith.constant 0.000000e+00 : f32
    %89 = vector.shape_cast %88 : vector<1x128xi1> to vector<1x128xi1>
    %90 = vector.broadcast %89 : vector<1x128xi1> to vector<16x128xi1>
    %91 = vector.broadcast %cst_41 : f32 to vector<16x128xf32>
    %92 = arith.select %90, %69, %91 : vector<16x128xi1>, vector<16x128xf32>
    %93 = arith.truncf %92 : vector<16x128xf32> to vector<16x128xbf16>
    %c2 = arith.constant 2 : index
    %c0_42 = arith.constant 0 : index
    %c0_43 = arith.constant 0 : index
    %94 = vector.load %arg7[%c2, %c0_42, %c0_43] : memref<9x16x16xbf16, #tpu.memory_space<vmem>>, vector<1x16x16xbf16>
    %95 = vector.shape_cast %94 : vector<1x16x16xbf16> to vector<16x16xbf16>
    %cst_44 = arith.constant dense<0.000000e+00> : vector<16x128xf32>
    %96 = tpu.matmul %95, %93, %cst_44 {dimension_numbers = #tpu.dot_dimension_numbers<[1], [0], [0], [1], [0, 0, 1, 1], [], []>} : vector<16x16xbf16>, vector<16x128xbf16>, vector<16x128xf32> -> vector<16x128xf32>
    %97 = arith.addf %68, %96 : vector<16x128xf32>
    %c1_i32_45 = arith.constant 1 : i32
    %98 = tpu.dynamic_rotate %9 by %c1_i32_45 dim 1 : vector<16x128xf32>, i32 -> vector<16x128xf32>
    %c0_i32_46 = arith.constant 0 : i32
    %99 = vector.broadcast %c0_i32_46 : i32 to vector<1x128xi32>
    %100 = arith.addi %0, %99 : vector<1x128xi32>
    %c0_i32_47 = arith.constant 0 : i32
    %101 = vector.broadcast %c0_i32_47 : i32 to vector<1x128xi32>
    %102 = arith.cmpi sge, %100, %101 : vector<1x128xi32>
    %c0_i32_48 = arith.constant 0 : i32
    %103 = vector.broadcast %c0_i32_48 : i32 to vector<1x128xi32>
    %104 = arith.addi %0, %103 : vector<1x128xi32>
    %c8_i32_49 = arith.constant 8 : i32
    %105 = vector.broadcast %c8_i32_49 : i32 to vector<1x128xi32>
    %106 = arith.cmpi slt, %104, %105 : vector<1x128xi32>
    %107 = arith.andi %102, %106 : vector<1x128xi1>
    %c-1_i32_50 = arith.constant -1 : i32
    %108 = vector.broadcast %c-1_i32_50 : i32 to vector<1x128xi32>
    %109 = arith.addi %1, %108 : vector<1x128xi32>
    %c0_i32_51 = arith.constant 0 : i32
    %110 = vector.broadcast %c0_i32_51 : i32 to vector<1x128xi32>
    %111 = arith.cmpi sge, %109, %110 : vector<1x128xi32>
    %112 = arith.andi %107, %111 : vector<1x128xi1>
    %c-1_i32_52 = arith.constant -1 : i32
    %113 = vector.broadcast %c-1_i32_52 : i32 to vector<1x128xi32>
    %114 = arith.addi %1, %113 : vector<1x128xi32>
    %c8_i32_53 = arith.constant 8 : i32
    %115 = vector.broadcast %c8_i32_53 : i32 to vector<1x128xi32>
    %116 = arith.cmpi slt, %114, %115 : vector<1x128xi32>
    %117 = arith.andi %112, %116 : vector<1x128xi1>
    %cst_54 = arith.constant 0.000000e+00 : f32
    %118 = vector.shape_cast %117 : vector<1x128xi1> to vector<1x128xi1>
    %119 = vector.broadcast %118 : vector<1x128xi1> to vector<16x128xi1>
    %120 = vector.broadcast %cst_54 : f32 to vector<16x128xf32>
    %121 = arith.select %119, %98, %120 : vector<16x128xi1>, vector<16x128xf32>
    %122 = arith.truncf %121 : vector<16x128xf32> to vector<16x128xbf16>
    %c3 = arith.constant 3 : index
    %c0_55 = arith.constant 0 : index
    %c0_56 = arith.constant 0 : index
    %123 = vector.load %arg7[%c3, %c0_55, %c0_56] : memref<9x16x16xbf16, #tpu.memory_space<vmem>>, vector<1x16x16xbf16>
    %124 = vector.shape_cast %123 : vector<1x16x16xbf16> to vector<16x16xbf16>
    %cst_57 = arith.constant dense<0.000000e+00> : vector<16x128xf32>
    %125 = tpu.matmul %124, %122, %cst_57 {dimension_numbers = #tpu.dot_dimension_numbers<[1], [0], [0], [1], [0, 0, 1, 1], [], []>} : vector<16x16xbf16>, vector<16x128xbf16>, vector<16x128xf32> -> vector<16x128xf32>
    %126 = arith.addf %97, %125 : vector<16x128xf32>
    %c0_i32_58 = arith.constant 0 : i32
    %127 = vector.broadcast %c0_i32_58 : i32 to vector<1x128xi32>
    %128 = arith.addi %0, %127 : vector<1x128xi32>
    %c0_i32_59 = arith.constant 0 : i32
    %129 = vector.broadcast %c0_i32_59 : i32 to vector<1x128xi32>
    %130 = arith.cmpi sge, %128, %129 : vector<1x128xi32>
    %c0_i32_60 = arith.constant 0 : i32
    %131 = vector.broadcast %c0_i32_60 : i32 to vector<1x128xi32>
    %132 = arith.addi %0, %131 : vector<1x128xi32>
    %c8_i32_61 = arith.constant 8 : i32
    %133 = vector.broadcast %c8_i32_61 : i32 to vector<1x128xi32>
    %134 = arith.cmpi slt, %132, %133 : vector<1x128xi32>
    %135 = arith.andi %130, %134 : vector<1x128xi1>
    %c0_i32_62 = arith.constant 0 : i32
    %136 = vector.broadcast %c0_i32_62 : i32 to vector<1x128xi32>
    %137 = arith.addi %1, %136 : vector<1x128xi32>
    %c0_i32_63 = arith.constant 0 : i32
    %138 = vector.broadcast %c0_i32_63 : i32 to vector<1x128xi32>
    %139 = arith.cmpi sge, %137, %138 : vector<1x128xi32>
    %140 = arith.andi %135, %139 : vector<1x128xi1>
    %c0_i32_64 = arith.constant 0 : i32
    %141 = vector.broadcast %c0_i32_64 : i32 to vector<1x128xi32>
    %142 = arith.addi %1, %141 : vector<1x128xi32>
    %c8_i32_65 = arith.constant 8 : i32
    %143 = vector.broadcast %c8_i32_65 : i32 to vector<1x128xi32>
    %144 = arith.cmpi slt, %142, %143 : vector<1x128xi32>
    %145 = arith.andi %140, %144 : vector<1x128xi1>
    %cst_66 = arith.constant 0.000000e+00 : f32
    %146 = vector.shape_cast %145 : vector<1x128xi1> to vector<1x128xi1>
    %147 = vector.broadcast %146 : vector<1x128xi1> to vector<16x128xi1>
    %148 = vector.broadcast %cst_66 : f32 to vector<16x128xf32>
    %149 = arith.select %147, %9, %148 : vector<16x128xi1>, vector<16x128xf32>
    %150 = arith.truncf %149 : vector<16x128xf32> to vector<16x128xbf16>
    %c4 = arith.constant 4 : index
    %c0_67 = arith.constant 0 : index
    %c0_68 = arith.constant 0 : index
    %151 = vector.load %arg7[%c4, %c0_67, %c0_68] : memref<9x16x16xbf16, #tpu.memory_space<vmem>>, vector<1x16x16xbf16>
    %152 = vector.shape_cast %151 : vector<1x16x16xbf16> to vector<16x16xbf16>
    %cst_69 = arith.constant dense<0.000000e+00> : vector<16x128xf32>
    %153 = tpu.matmul %152, %150, %cst_69 {dimension_numbers = #tpu.dot_dimension_numbers<[1], [0], [0], [1], [0, 0, 1, 1], [], []>} : vector<16x16xbf16>, vector<16x128xbf16>, vector<16x128xf32> -> vector<16x128xf32>
    %154 = arith.addf %126, %153 : vector<16x128xf32>
    %c127_i32 = arith.constant 127 : i32
    %155 = tpu.dynamic_rotate %9 by %c127_i32 dim 1 : vector<16x128xf32>, i32 -> vector<16x128xf32>
    %c0_i32_70 = arith.constant 0 : i32
    %156 = vector.broadcast %c0_i32_70 : i32 to vector<1x128xi32>
    %157 = arith.addi %0, %156 : vector<1x128xi32>
    %c0_i32_71 = arith.constant 0 : i32
    %158 = vector.broadcast %c0_i32_71 : i32 to vector<1x128xi32>
    %159 = arith.cmpi sge, %157, %158 : vector<1x128xi32>
    %c0_i32_72 = arith.constant 0 : i32
    %160 = vector.broadcast %c0_i32_72 : i32 to vector<1x128xi32>
    %161 = arith.addi %0, %160 : vector<1x128xi32>
    %c8_i32_73 = arith.constant 8 : i32
    %162 = vector.broadcast %c8_i32_73 : i32 to vector<1x128xi32>
    %163 = arith.cmpi slt, %161, %162 : vector<1x128xi32>
    %164 = arith.andi %159, %163 : vector<1x128xi1>
    %c1_i32_74 = arith.constant 1 : i32
    %165 = vector.broadcast %c1_i32_74 : i32 to vector<1x128xi32>
    %166 = arith.addi %1, %165 : vector<1x128xi32>
    %c0_i32_75 = arith.constant 0 : i32
    %167 = vector.broadcast %c0_i32_75 : i32 to vector<1x128xi32>
    %168 = arith.cmpi sge, %166, %167 : vector<1x128xi32>
    %169 = arith.andi %164, %168 : vector<1x128xi1>
    %c1_i32_76 = arith.constant 1 : i32
    %170 = vector.broadcast %c1_i32_76 : i32 to vector<1x128xi32>
    %171 = arith.addi %1, %170 : vector<1x128xi32>
    %c8_i32_77 = arith.constant 8 : i32
    %172 = vector.broadcast %c8_i32_77 : i32 to vector<1x128xi32>
    %173 = arith.cmpi slt, %171, %172 : vector<1x128xi32>
    %174 = arith.andi %169, %173 : vector<1x128xi1>
    %cst_78 = arith.constant 0.000000e+00 : f32
    %175 = vector.shape_cast %174 : vector<1x128xi1> to vector<1x128xi1>
    %176 = vector.broadcast %175 : vector<1x128xi1> to vector<16x128xi1>
    %177 = vector.broadcast %cst_78 : f32 to vector<16x128xf32>
    %178 = arith.select %176, %155, %177 : vector<16x128xi1>, vector<16x128xf32>
    %179 = arith.truncf %178 : vector<16x128xf32> to vector<16x128xbf16>
    %c5 = arith.constant 5 : index
    %c0_79 = arith.constant 0 : index
    %c0_80 = arith.constant 0 : index
    %180 = vector.load %arg7[%c5, %c0_79, %c0_80] : memref<9x16x16xbf16, #tpu.memory_space<vmem>>, vector<1x16x16xbf16>
    %181 = vector.shape_cast %180 : vector<1x16x16xbf16> to vector<16x16xbf16>
    %cst_81 = arith.constant dense<0.000000e+00> : vector<16x128xf32>
    %182 = tpu.matmul %181, %179, %cst_81 {dimension_numbers = #tpu.dot_dimension_numbers<[1], [0], [0], [1], [0, 0, 1, 1], [], []>} : vector<16x16xbf16>, vector<16x128xbf16>, vector<16x128xf32> -> vector<16x128xf32>
    %183 = arith.addf %154, %182 : vector<16x128xf32>
    %c121_i32 = arith.constant 121 : i32
    %184 = tpu.dynamic_rotate %9 by %c121_i32 dim 1 : vector<16x128xf32>, i32 -> vector<16x128xf32>
    %c1_i32_82 = arith.constant 1 : i32
    %185 = vector.broadcast %c1_i32_82 : i32 to vector<1x128xi32>
    %186 = arith.addi %0, %185 : vector<1x128xi32>
    %c0_i32_83 = arith.constant 0 : i32
    %187 = vector.broadcast %c0_i32_83 : i32 to vector<1x128xi32>
    %188 = arith.cmpi sge, %186, %187 : vector<1x128xi32>
    %c1_i32_84 = arith.constant 1 : i32
    %189 = vector.broadcast %c1_i32_84 : i32 to vector<1x128xi32>
    %190 = arith.addi %0, %189 : vector<1x128xi32>
    %c8_i32_85 = arith.constant 8 : i32
    %191 = vector.broadcast %c8_i32_85 : i32 to vector<1x128xi32>
    %192 = arith.cmpi slt, %190, %191 : vector<1x128xi32>
    %193 = arith.andi %188, %192 : vector<1x128xi1>
    %c-1_i32_86 = arith.constant -1 : i32
    %194 = vector.broadcast %c-1_i32_86 : i32 to vector<1x128xi32>
    %195 = arith.addi %1, %194 : vector<1x128xi32>
    %c0_i32_87 = arith.constant 0 : i32
    %196 = vector.broadcast %c0_i32_87 : i32 to vector<1x128xi32>
    %197 = arith.cmpi sge, %195, %196 : vector<1x128xi32>
    %198 = arith.andi %193, %197 : vector<1x128xi1>
    %c-1_i32_88 = arith.constant -1 : i32
    %199 = vector.broadcast %c-1_i32_88 : i32 to vector<1x128xi32>
    %200 = arith.addi %1, %199 : vector<1x128xi32>
    %c8_i32_89 = arith.constant 8 : i32
    %201 = vector.broadcast %c8_i32_89 : i32 to vector<1x128xi32>
    %202 = arith.cmpi slt, %200, %201 : vector<1x128xi32>
    %203 = arith.andi %198, %202 : vector<1x128xi1>
    %cst_90 = arith.constant 0.000000e+00 : f32
    %204 = vector.shape_cast %203 : vector<1x128xi1> to vector<1x128xi1>
    %205 = vector.broadcast %204 : vector<1x128xi1> to vector<16x128xi1>
    %206 = vector.broadcast %cst_90 : f32 to vector<16x128xf32>
    %207 = arith.select %205, %184, %206 : vector<16x128xi1>, vector<16x128xf32>
    %208 = arith.truncf %207 : vector<16x128xf32> to vector<16x128xbf16>
    %c6 = arith.constant 6 : index
    %c0_91 = arith.constant 0 : index
    %c0_92 = arith.constant 0 : index
    %209 = vector.load %arg7[%c6, %c0_91, %c0_92] : memref<9x16x16xbf16, #tpu.memory_space<vmem>>, vector<1x16x16xbf16>
    %210 = vector.shape_cast %209 : vector<1x16x16xbf16> to vector<16x16xbf16>
    %cst_93 = arith.constant dense<0.000000e+00> : vector<16x128xf32>
    %211 = tpu.matmul %210, %208, %cst_93 {dimension_numbers = #tpu.dot_dimension_numbers<[1], [0], [0], [1], [0, 0, 1, 1], [], []>} : vector<16x16xbf16>, vector<16x128xbf16>, vector<16x128xf32> -> vector<16x128xf32>
    %212 = arith.addf %183, %211 : vector<16x128xf32>
    %c120_i32 = arith.constant 120 : i32
    %213 = tpu.dynamic_rotate %9 by %c120_i32 dim 1 : vector<16x128xf32>, i32 -> vector<16x128xf32>
    %c1_i32_94 = arith.constant 1 : i32
    %214 = vector.broadcast %c1_i32_94 : i32 to vector<1x128xi32>
    %215 = arith.addi %0, %214 : vector<1x128xi32>
    %c0_i32_95 = arith.constant 0 : i32
    %216 = vector.broadcast %c0_i32_95 : i32 to vector<1x128xi32>
    %217 = arith.cmpi sge, %215, %216 : vector<1x128xi32>
    %c1_i32_96 = arith.constant 1 : i32
    %218 = vector.broadcast %c1_i32_96 : i32 to vector<1x128xi32>
    %219 = arith.addi %0, %218 : vector<1x128xi32>
    %c8_i32_97 = arith.constant 8 : i32
    %220 = vector.broadcast %c8_i32_97 : i32 to vector<1x128xi32>
    %221 = arith.cmpi slt, %219, %220 : vector<1x128xi32>
    %222 = arith.andi %217, %221 : vector<1x128xi1>
    %c0_i32_98 = arith.constant 0 : i32
    %223 = vector.broadcast %c0_i32_98 : i32 to vector<1x128xi32>
    %224 = arith.addi %1, %223 : vector<1x128xi32>
    %c0_i32_99 = arith.constant 0 : i32
    %225 = vector.broadcast %c0_i32_99 : i32 to vector<1x128xi32>
    %226 = arith.cmpi sge, %224, %225 : vector<1x128xi32>
    %227 = arith.andi %222, %226 : vector<1x128xi1>
    %c0_i32_100 = arith.constant 0 : i32
    %228 = vector.broadcast %c0_i32_100 : i32 to vector<1x128xi32>
    %229 = arith.addi %1, %228 : vector<1x128xi32>
    %c8_i32_101 = arith.constant 8 : i32
    %230 = vector.broadcast %c8_i32_101 : i32 to vector<1x128xi32>
    %231 = arith.cmpi slt, %229, %230 : vector<1x128xi32>
    %232 = arith.andi %227, %231 : vector<1x128xi1>
    %cst_102 = arith.constant 0.000000e+00 : f32
    %233 = vector.shape_cast %232 : vector<1x128xi1> to vector<1x128xi1>
    %234 = vector.broadcast %233 : vector<1x128xi1> to vector<16x128xi1>
    %235 = vector.broadcast %cst_102 : f32 to vector<16x128xf32>
    %236 = arith.select %234, %213, %235 : vector<16x128xi1>, vector<16x128xf32>
    %237 = arith.truncf %236 : vector<16x128xf32> to vector<16x128xbf16>
    %c7 = arith.constant 7 : index
    %c0_103 = arith.constant 0 : index
    %c0_104 = arith.constant 0 : index
    %238 = vector.load %arg7[%c7, %c0_103, %c0_104] : memref<9x16x16xbf16, #tpu.memory_space<vmem>>, vector<1x16x16xbf16>
    %239 = vector.shape_cast %238 : vector<1x16x16xbf16> to vector<16x16xbf16>
    %cst_105 = arith.constant dense<0.000000e+00> : vector<16x128xf32>
    %240 = tpu.matmul %239, %237, %cst_105 {dimension_numbers = #tpu.dot_dimension_numbers<[1], [0], [0], [1], [0, 0, 1, 1], [], []>} : vector<16x16xbf16>, vector<16x128xbf16>, vector<16x128xf32> -> vector<16x128xf32>
    %241 = arith.addf %212, %240 : vector<16x128xf32>
    %c119_i32 = arith.constant 119 : i32
    %242 = tpu.dynamic_rotate %9 by %c119_i32 dim 1 : vector<16x128xf32>, i32 -> vector<16x128xf32>
    %c1_i32_106 = arith.constant 1 : i32
    %243 = vector.broadcast %c1_i32_106 : i32 to vector<1x128xi32>
    %244 = arith.addi %0, %243 : vector<1x128xi32>
    %c0_i32_107 = arith.constant 0 : i32
    %245 = vector.broadcast %c0_i32_107 : i32 to vector<1x128xi32>
    %246 = arith.cmpi sge, %244, %245 : vector<1x128xi32>
    %c1_i32_108 = arith.constant 1 : i32
    %247 = vector.broadcast %c1_i32_108 : i32 to vector<1x128xi32>
    %248 = arith.addi %0, %247 : vector<1x128xi32>
    %c8_i32_109 = arith.constant 8 : i32
    %249 = vector.broadcast %c8_i32_109 : i32 to vector<1x128xi32>
    %250 = arith.cmpi slt, %248, %249 : vector<1x128xi32>
    %251 = arith.andi %246, %250 : vector<1x128xi1>
    %c1_i32_110 = arith.constant 1 : i32
    %252 = vector.broadcast %c1_i32_110 : i32 to vector<1x128xi32>
    %253 = arith.addi %1, %252 : vector<1x128xi32>
    %c0_i32_111 = arith.constant 0 : i32
    %254 = vector.broadcast %c0_i32_111 : i32 to vector<1x128xi32>
    %255 = arith.cmpi sge, %253, %254 : vector<1x128xi32>
    %256 = arith.andi %251, %255 : vector<1x128xi1>
    %c1_i32_112 = arith.constant 1 : i32
    %257 = vector.broadcast %c1_i32_112 : i32 to vector<1x128xi32>
    %258 = arith.addi %1, %257 : vector<1x128xi32>
    %c8_i32_113 = arith.constant 8 : i32
    %259 = vector.broadcast %c8_i32_113 : i32 to vector<1x128xi32>
    %260 = arith.cmpi slt, %258, %259 : vector<1x128xi32>
    %261 = arith.andi %256, %260 : vector<1x128xi1>
    %cst_114 = arith.constant 0.000000e+00 : f32
    %262 = vector.shape_cast %261 : vector<1x128xi1> to vector<1x128xi1>
    %263 = vector.broadcast %262 : vector<1x128xi1> to vector<16x128xi1>
    %264 = vector.broadcast %cst_114 : f32 to vector<16x128xf32>
    %265 = arith.select %263, %242, %264 : vector<16x128xi1>, vector<16x128xf32>
    %266 = arith.truncf %265 : vector<16x128xf32> to vector<16x128xbf16>
    %c8 = arith.constant 8 : index
    %c0_115 = arith.constant 0 : index
    %c0_116 = arith.constant 0 : index
    %267 = vector.load %arg7[%c8, %c0_115, %c0_116] : memref<9x16x16xbf16, #tpu.memory_space<vmem>>, vector<1x16x16xbf16>
    %268 = vector.shape_cast %267 : vector<1x16x16xbf16> to vector<16x16xbf16>
    %cst_117 = arith.constant dense<0.000000e+00> : vector<16x128xf32>
    %269 = tpu.matmul %268, %266, %cst_117 {dimension_numbers = #tpu.dot_dimension_numbers<[1], [0], [0], [1], [0, 0, 1, 1], [], []>} : vector<16x16xbf16>, vector<16x128xbf16>, vector<16x128xf32> -> vector<16x128xf32>
    %270 = arith.addf %241, %269 : vector<16x128xf32>
    %c0_118 = arith.constant 0 : index
    %c0_119 = arith.constant 0 : index
    %271 = vector.load %arg8[%c0_118, %c0_119] : memref<16x1xf32, #tpu.memory_space<vmem>>, vector<16x1xf32>
    %272 = vector.broadcast %271 : vector<16x1xf32> to vector<16x128xf32>
    %273 = arith.addf %270, %272 : vector<16x128xf32>
    %c0_120 = arith.constant 0 : index
    %c0_121 = arith.constant 0 : index
    %274 = vector.load %arg9[%c0_120, %c0_121] : memref<16x4xbf16, #tpu.memory_space<vmem>>, vector<16x4xbf16>
    %c0_122 = arith.constant 0 : index
    %c0_123 = arith.constant 0 : index
    %275 = vector.load %arg4[%c0_122, %c0_123] : memref<4x128xbf16, #tpu.memory_space<vmem>>, vector<4x128xbf16>
    %cst_124 = arith.constant dense<0.000000e+00> : vector<16x128xf32>
    %276 = tpu.matmul %274, %275, %cst_124 {dimension_numbers = #tpu.dot_dimension_numbers<[1], [0], [0], [1], [0, 0, 1, 1], [], []>} : vector<16x4xbf16>, vector<4x128xbf16>, vector<16x128xf32> -> vector<16x128xf32>
    %277 = arith.addf %273, %276 : vector<16x128xf32>
    %cst_125 = arith.constant 0.000000e+00 : f32
    %278 = vector.broadcast %cst_125 : f32 to vector<16x128xf32>
    %279 = arith.maximumf %277, %278 : vector<16x128xf32>
    %280 = arith.truncf %279 : vector<16x128xf32> to vector<16x128xbf16>
    %c0_126 = arith.constant 0 : index
    %c0_127 = arith.constant 0 : index
    %281 = vector.load %arg10[%c0_126, %c0_127] : memref<16x128xbf16, #tpu.memory_space<vmem>>, vector<16x128xbf16>
    tpu.vector_store %arg10[%c0_126, %c0_127], %280 {strides = array<i32>} : memref<16x128xbf16, #tpu.memory_space<vmem>>, vector<16x128xbf16>,
    return
  }
  func.func @transform_0(%arg0: i32) -> (i32, i32) {
    %c0_i32 = arith.constant 0 : i32
    %c0_i32_0 = arith.constant 0 : i32
    %c0_i32_1 = arith.constant 0 : i32
    return %c0_i32, %c0_i32_0 : i32, i32
  }
  func.func @transform_1(%arg0: i32) -> (i32, i32) {
    %c0_i32 = arith.constant 0 : i32
    %c0_i32_0 = arith.constant 0 : i32
    %c0_i32_1 = arith.constant 0 : i32
    return %c0_i32, %c0_i32_0 : i32, i32
  }
  func.func @transform_2(%arg0: i32) -> (i32, i32) {
    %c0_i32 = arith.constant 0 : i32
    %c0_i32_0 = arith.constant 0 : i32
    return %c0_i32, %arg0 : i32, i32
  }
  func.func @transform_3(%arg0: i32) -> (i32, i32) {
    %c0_i32 = arith.constant 0 : i32
    %c0_i32_0 = arith.constant 0 : i32
    return %c0_i32, %arg0 : i32, i32
  }
  func.func @transform_4(%arg0: i32) -> (i32, i32) {
    %c0_i32 = arith.constant 0 : i32
    %c0_i32_0 = arith.constant 0 : i32
    %c0_i32_1 = arith.constant 0 : i32
    return %c0_i32, %c0_i32_0 : i32, i32
  }
  func.func @transform_5(%arg0: i32) -> (i32, i32) {
    %c0_i32 = arith.constant 0 : i32
    %c0_i32_0 = arith.constant 0 : i32
    %c0_i32_1 = arith.constant 0 : i32
    return %c0_i32, %c0_i32_0 : i32, i32
  }
  func.func @transform_6(%arg0: i32) -> (i32, i32, i32) {
    %c0_i32 = arith.constant 0 : i32
    %c0_i32_0 = arith.constant 0 : i32
    %c0_i32_1 = arith.constant 0 : i32
    %c0_i32_2 = arith.constant 0 : i32
    return %c0_i32, %c0_i32_0, %c0_i32_1 : i32, i32, i32
  }
  func.func @transform_7(%arg0: i32) -> (i32, i32) {
    %c0_i32 = arith.constant 0 : i32
    %c0_i32_0 = arith.constant 0 : i32
    %c0_i32_1 = arith.constant 0 : i32
    return %c0_i32, %c0_i32_0 : i32, i32
  }
  func.func @transform_8(%arg0: i32) -> (i32, i32) {
    %c0_i32 = arith.constant 0 : i32
    %c0_i32_0 = arith.constant 0 : i32
    %c0_i32_1 = arith.constant 0 : i32
    return %c0_i32, %c0_i32_0 : i32, i32
  }
  func.func @transform_9(%arg0: i32) -> (i32, i32) {
    %c0_i32 = arith.constant 0 : i32
    %c0_i32_0 = arith.constant 0 : i32
    return %c0_i32, %arg0 : i32, i32
  }
}

module attributes {stable_mosaic.version = 11 : i64} {
  func.func @_resblock_s1_kernel(%arg0: i32, %arg1: memref<1x128xi32, #tpu.memory_space<vmem>>, %arg2: memref<1x128xi32, #tpu.memory_space<vmem>>, %arg3: memref<16x128xbf16, #tpu.memory_space<vmem>>, %arg4: memref<9x16x16xbf16, #tpu.memory_space<vmem>>, %arg5: memref<16x1xf32, #tpu.memory_space<vmem>>, %arg6: memref<9x16x16xbf16, #tpu.memory_space<vmem>>, %arg7: memref<16x1xf32, #tpu.memory_space<vmem>>, %arg8: memref<16x128xf32, #tpu.memory_space<vmem>>) attributes {dimension_semantics = [#tpu.dimension_semantics<parallel>], iteration_bounds = array<i64: 1>, scalar_prefetch = 0 : i64, scratch_operands = 0 : i64, tpu.core_type = #tpu.core_type<tc>, window_params = [{pipeline_mode = #tpu.pipeline_mode<synchronous>, transform_indices = @transform_0, window_bounds = array<i64: 1, 128>}, {pipeline_mode = #tpu.pipeline_mode<synchronous>, transform_indices = @transform_1, window_bounds = array<i64: 1, 128>}, {transform_indices = @transform_2, window_bounds = array<i64: 16, 128>}, {pipeline_mode = #tpu.pipeline_mode<synchronous>, transform_indices = @transform_3, window_bounds = array<i64: 9, 16, 16>}, {pipeline_mode = #tpu.pipeline_mode<synchronous>, transform_indices = @transform_4, window_bounds = array<i64: 16, 1>}, {pipeline_mode = #tpu.pipeline_mode<synchronous>, transform_indices = @transform_5, window_bounds = array<i64: 9, 16, 16>}, {pipeline_mode = #tpu.pipeline_mode<synchronous>, transform_indices = @transform_6, window_bounds = array<i64: 16, 1>}, {transform_indices = @transform_7, window_bounds = array<i64: 16, 128>}]} {
    %c0 = arith.constant 0 : index
    %c0_0 = arith.constant 0 : index
    %0 = vector.load %arg1[%c0, %c0_0] : memref<1x128xi32, #tpu.memory_space<vmem>>, vector<1x128xi32>
    %c0_1 = arith.constant 0 : index
    %c0_2 = arith.constant 0 : index
    %1 = vector.load %arg2[%c0_1, %c0_2] : memref<1x128xi32, #tpu.memory_space<vmem>>, vector<1x128xi32>
    %c0_3 = arith.constant 0 : index
    %c0_4 = arith.constant 0 : index
    %2 = vector.load %arg3[%c0_3, %c0_4] : memref<16x128xbf16, #tpu.memory_space<vmem>>, vector<16x128xbf16>
    %3 = arith.extf %2 : vector<16x128xbf16> to vector<16x128xf32>
    %cst = arith.constant 0.000000e+00 : f32
    %4 = vector.broadcast %cst : f32 to vector<16x128xf32>
    %c9_i32 = arith.constant 9 : i32
    %5 = tpu.dynamic_rotate %3 by %c9_i32 dim 1 : vector<16x128xf32>, i32 -> vector<16x128xf32>
    %c-1_i32 = arith.constant -1 : i32
    %6 = vector.broadcast %c-1_i32 : i32 to vector<1x128xi32>
    %7 = arith.addi %0, %6 : vector<1x128xi32>
    %c0_i32 = arith.constant 0 : i32
    %8 = vector.broadcast %c0_i32 : i32 to vector<1x128xi32>
    %9 = arith.cmpi sge, %7, %8 : vector<1x128xi32>
    %c-1_i32_5 = arith.constant -1 : i32
    %10 = vector.broadcast %c-1_i32_5 : i32 to vector<1x128xi32>
    %11 = arith.addi %0, %10 : vector<1x128xi32>
    %c8_i32 = arith.constant 8 : i32
    %12 = vector.broadcast %c8_i32 : i32 to vector<1x128xi32>
    %13 = arith.cmpi slt, %11, %12 : vector<1x128xi32>
    %14 = arith.andi %9, %13 : vector<1x128xi1>
    %c-1_i32_6 = arith.constant -1 : i32
    %15 = vector.broadcast %c-1_i32_6 : i32 to vector<1x128xi32>
    %16 = arith.addi %1, %15 : vector<1x128xi32>
    %c0_i32_7 = arith.constant 0 : i32
    %17 = vector.broadcast %c0_i32_7 : i32 to vector<1x128xi32>
    %18 = arith.cmpi sge, %16, %17 : vector<1x128xi32>
    %19 = arith.andi %14, %18 : vector<1x128xi1>
    %c-1_i32_8 = arith.constant -1 : i32
    %20 = vector.broadcast %c-1_i32_8 : i32 to vector<1x128xi32>
    %21 = arith.addi %1, %20 : vector<1x128xi32>
    %c8_i32_9 = arith.constant 8 : i32
    %22 = vector.broadcast %c8_i32_9 : i32 to vector<1x128xi32>
    %23 = arith.cmpi slt, %21, %22 : vector<1x128xi32>
    %24 = arith.andi %19, %23 : vector<1x128xi1>
    %cst_10 = arith.constant 0.000000e+00 : f32
    %25 = vector.shape_cast %24 : vector<1x128xi1> to vector<1x128xi1>
    %26 = vector.broadcast %25 : vector<1x128xi1> to vector<16x128xi1>
    %27 = vector.broadcast %cst_10 : f32 to vector<16x128xf32>
    %28 = arith.select %26, %5, %27 : vector<16x128xi1>, vector<16x128xf32>
    %29 = arith.truncf %28 : vector<16x128xf32> to vector<16x128xbf16>
    %c0_11 = arith.constant 0 : index
    %c0_12 = arith.constant 0 : index
    %c0_13 = arith.constant 0 : index
    %30 = vector.load %arg4[%c0_11, %c0_12, %c0_13] : memref<9x16x16xbf16, #tpu.memory_space<vmem>>, vector<1x16x16xbf16>
    %31 = vector.shape_cast %30 : vector<1x16x16xbf16> to vector<16x16xbf16>
    %cst_14 = arith.constant dense<0.000000e+00> : vector<16x128xf32>
    %32 = tpu.matmul %31, %29, %cst_14 {dimension_numbers = #tpu.dot_dimension_numbers<[1], [0], [0], [1], [0, 0, 1, 1], [], []>} : vector<16x16xbf16>, vector<16x128xbf16>, vector<16x128xf32> -> vector<16x128xf32>
    %33 = arith.addf %4, %32 : vector<16x128xf32>
    %c8_i32_15 = arith.constant 8 : i32
    %34 = tpu.dynamic_rotate %3 by %c8_i32_15 dim 1 : vector<16x128xf32>, i32 -> vector<16x128xf32>
    %c-1_i32_16 = arith.constant -1 : i32
    %35 = vector.broadcast %c-1_i32_16 : i32 to vector<1x128xi32>
    %36 = arith.addi %0, %35 : vector<1x128xi32>
    %c0_i32_17 = arith.constant 0 : i32
    %37 = vector.broadcast %c0_i32_17 : i32 to vector<1x128xi32>
    %38 = arith.cmpi sge, %36, %37 : vector<1x128xi32>
    %c-1_i32_18 = arith.constant -1 : i32
    %39 = vector.broadcast %c-1_i32_18 : i32 to vector<1x128xi32>
    %40 = arith.addi %0, %39 : vector<1x128xi32>
    %c8_i32_19 = arith.constant 8 : i32
    %41 = vector.broadcast %c8_i32_19 : i32 to vector<1x128xi32>
    %42 = arith.cmpi slt, %40, %41 : vector<1x128xi32>
    %43 = arith.andi %38, %42 : vector<1x128xi1>
    %c0_i32_20 = arith.constant 0 : i32
    %44 = vector.broadcast %c0_i32_20 : i32 to vector<1x128xi32>
    %45 = arith.addi %1, %44 : vector<1x128xi32>
    %c0_i32_21 = arith.constant 0 : i32
    %46 = vector.broadcast %c0_i32_21 : i32 to vector<1x128xi32>
    %47 = arith.cmpi sge, %45, %46 : vector<1x128xi32>
    %48 = arith.andi %43, %47 : vector<1x128xi1>
    %c0_i32_22 = arith.constant 0 : i32
    %49 = vector.broadcast %c0_i32_22 : i32 to vector<1x128xi32>
    %50 = arith.addi %1, %49 : vector<1x128xi32>
    %c8_i32_23 = arith.constant 8 : i32
    %51 = vector.broadcast %c8_i32_23 : i32 to vector<1x128xi32>
    %52 = arith.cmpi slt, %50, %51 : vector<1x128xi32>
    %53 = arith.andi %48, %52 : vector<1x128xi1>
    %cst_24 = arith.constant 0.000000e+00 : f32
    %54 = vector.shape_cast %53 : vector<1x128xi1> to vector<1x128xi1>
    %55 = vector.broadcast %54 : vector<1x128xi1> to vector<16x128xi1>
    %56 = vector.broadcast %cst_24 : f32 to vector<16x128xf32>
    %57 = arith.select %55, %34, %56 : vector<16x128xi1>, vector<16x128xf32>
    %58 = arith.truncf %57 : vector<16x128xf32> to vector<16x128xbf16>
    %c1 = arith.constant 1 : index
    %c0_25 = arith.constant 0 : index
    %c0_26 = arith.constant 0 : index
    %59 = vector.load %arg4[%c1, %c0_25, %c0_26] : memref<9x16x16xbf16, #tpu.memory_space<vmem>>, vector<1x16x16xbf16>
    %60 = vector.shape_cast %59 : vector<1x16x16xbf16> to vector<16x16xbf16>
    %cst_27 = arith.constant dense<0.000000e+00> : vector<16x128xf32>
    %61 = tpu.matmul %60, %58, %cst_27 {dimension_numbers = #tpu.dot_dimension_numbers<[1], [0], [0], [1], [0, 0, 1, 1], [], []>} : vector<16x16xbf16>, vector<16x128xbf16>, vector<16x128xf32> -> vector<16x128xf32>
    %62 = arith.addf %33, %61 : vector<16x128xf32>
    %c7_i32 = arith.constant 7 : i32
    %63 = tpu.dynamic_rotate %3 by %c7_i32 dim 1 : vector<16x128xf32>, i32 -> vector<16x128xf32>
    %c-1_i32_28 = arith.constant -1 : i32
    %64 = vector.broadcast %c-1_i32_28 : i32 to vector<1x128xi32>
    %65 = arith.addi %0, %64 : vector<1x128xi32>
    %c0_i32_29 = arith.constant 0 : i32
    %66 = vector.broadcast %c0_i32_29 : i32 to vector<1x128xi32>
    %67 = arith.cmpi sge, %65, %66 : vector<1x128xi32>
    %c-1_i32_30 = arith.constant -1 : i32
    %68 = vector.broadcast %c-1_i32_30 : i32 to vector<1x128xi32>
    %69 = arith.addi %0, %68 : vector<1x128xi32>
    %c8_i32_31 = arith.constant 8 : i32
    %70 = vector.broadcast %c8_i32_31 : i32 to vector<1x128xi32>
    %71 = arith.cmpi slt, %69, %70 : vector<1x128xi32>
    %72 = arith.andi %67, %71 : vector<1x128xi1>
    %c1_i32 = arith.constant 1 : i32
    %73 = vector.broadcast %c1_i32 : i32 to vector<1x128xi32>
    %74 = arith.addi %1, %73 : vector<1x128xi32>
    %c0_i32_32 = arith.constant 0 : i32
    %75 = vector.broadcast %c0_i32_32 : i32 to vector<1x128xi32>
    %76 = arith.cmpi sge, %74, %75 : vector<1x128xi32>
    %77 = arith.andi %72, %76 : vector<1x128xi1>
    %c1_i32_33 = arith.constant 1 : i32
    %78 = vector.broadcast %c1_i32_33 : i32 to vector<1x128xi32>
    %79 = arith.addi %1, %78 : vector<1x128xi32>
    %c8_i32_34 = arith.constant 8 : i32
    %80 = vector.broadcast %c8_i32_34 : i32 to vector<1x128xi32>
    %81 = arith.cmpi slt, %79, %80 : vector<1x128xi32>
    %82 = arith.andi %77, %81 : vector<1x128xi1>
    %cst_35 = arith.constant 0.000000e+00 : f32
    %83 = vector.shape_cast %82 : vector<1x128xi1> to vector<1x128xi1>
    %84 = vector.broadcast %83 : vector<1x128xi1> to vector<16x128xi1>
    %85 = vector.broadcast %cst_35 : f32 to vector<16x128xf32>
    %86 = arith.select %84, %63, %85 : vector<16x128xi1>, vector<16x128xf32>
    %87 = arith.truncf %86 : vector<16x128xf32> to vector<16x128xbf16>
    %c2 = arith.constant 2 : index
    %c0_36 = arith.constant 0 : index
    %c0_37 = arith.constant 0 : index
    %88 = vector.load %arg4[%c2, %c0_36, %c0_37] : memref<9x16x16xbf16, #tpu.memory_space<vmem>>, vector<1x16x16xbf16>
    %89 = vector.shape_cast %88 : vector<1x16x16xbf16> to vector<16x16xbf16>
    %cst_38 = arith.constant dense<0.000000e+00> : vector<16x128xf32>
    %90 = tpu.matmul %89, %87, %cst_38 {dimension_numbers = #tpu.dot_dimension_numbers<[1], [0], [0], [1], [0, 0, 1, 1], [], []>} : vector<16x16xbf16>, vector<16x128xbf16>, vector<16x128xf32> -> vector<16x128xf32>
    %91 = arith.addf %62, %90 : vector<16x128xf32>
    %c1_i32_39 = arith.constant 1 : i32
    %92 = tpu.dynamic_rotate %3 by %c1_i32_39 dim 1 : vector<16x128xf32>, i32 -> vector<16x128xf32>
    %c0_i32_40 = arith.constant 0 : i32
    %93 = vector.broadcast %c0_i32_40 : i32 to vector<1x128xi32>
    %94 = arith.addi %0, %93 : vector<1x128xi32>
    %c0_i32_41 = arith.constant 0 : i32
    %95 = vector.broadcast %c0_i32_41 : i32 to vector<1x128xi32>
    %96 = arith.cmpi sge, %94, %95 : vector<1x128xi32>
    %c0_i32_42 = arith.constant 0 : i32
    %97 = vector.broadcast %c0_i32_42 : i32 to vector<1x128xi32>
    %98 = arith.addi %0, %97 : vector<1x128xi32>
    %c8_i32_43 = arith.constant 8 : i32
    %99 = vector.broadcast %c8_i32_43 : i32 to vector<1x128xi32>
    %100 = arith.cmpi slt, %98, %99 : vector<1x128xi32>
    %101 = arith.andi %96, %100 : vector<1x128xi1>
    %c-1_i32_44 = arith.constant -1 : i32
    %102 = vector.broadcast %c-1_i32_44 : i32 to vector<1x128xi32>
    %103 = arith.addi %1, %102 : vector<1x128xi32>
    %c0_i32_45 = arith.constant 0 : i32
    %104 = vector.broadcast %c0_i32_45 : i32 to vector<1x128xi32>
    %105 = arith.cmpi sge, %103, %104 : vector<1x128xi32>
    %106 = arith.andi %101, %105 : vector<1x128xi1>
    %c-1_i32_46 = arith.constant -1 : i32
    %107 = vector.broadcast %c-1_i32_46 : i32 to vector<1x128xi32>
    %108 = arith.addi %1, %107 : vector<1x128xi32>
    %c8_i32_47 = arith.constant 8 : i32
    %109 = vector.broadcast %c8_i32_47 : i32 to vector<1x128xi32>
    %110 = arith.cmpi slt, %108, %109 : vector<1x128xi32>
    %111 = arith.andi %106, %110 : vector<1x128xi1>
    %cst_48 = arith.constant 0.000000e+00 : f32
    %112 = vector.shape_cast %111 : vector<1x128xi1> to vector<1x128xi1>
    %113 = vector.broadcast %112 : vector<1x128xi1> to vector<16x128xi1>
    %114 = vector.broadcast %cst_48 : f32 to vector<16x128xf32>
    %115 = arith.select %113, %92, %114 : vector<16x128xi1>, vector<16x128xf32>
    %116 = arith.truncf %115 : vector<16x128xf32> to vector<16x128xbf16>
    %c3 = arith.constant 3 : index
    %c0_49 = arith.constant 0 : index
    %c0_50 = arith.constant 0 : index
    %117 = vector.load %arg4[%c3, %c0_49, %c0_50] : memref<9x16x16xbf16, #tpu.memory_space<vmem>>, vector<1x16x16xbf16>
    %118 = vector.shape_cast %117 : vector<1x16x16xbf16> to vector<16x16xbf16>
    %cst_51 = arith.constant dense<0.000000e+00> : vector<16x128xf32>
    %119 = tpu.matmul %118, %116, %cst_51 {dimension_numbers = #tpu.dot_dimension_numbers<[1], [0], [0], [1], [0, 0, 1, 1], [], []>} : vector<16x16xbf16>, vector<16x128xbf16>, vector<16x128xf32> -> vector<16x128xf32>
    %120 = arith.addf %91, %119 : vector<16x128xf32>
    %c0_i32_52 = arith.constant 0 : i32
    %121 = vector.broadcast %c0_i32_52 : i32 to vector<1x128xi32>
    %122 = arith.addi %0, %121 : vector<1x128xi32>
    %c0_i32_53 = arith.constant 0 : i32
    %123 = vector.broadcast %c0_i32_53 : i32 to vector<1x128xi32>
    %124 = arith.cmpi sge, %122, %123 : vector<1x128xi32>
    %c0_i32_54 = arith.constant 0 : i32
    %125 = vector.broadcast %c0_i32_54 : i32 to vector<1x128xi32>
    %126 = arith.addi %0, %125 : vector<1x128xi32>
    %c8_i32_55 = arith.constant 8 : i32
    %127 = vector.broadcast %c8_i32_55 : i32 to vector<1x128xi32>
    %128 = arith.cmpi slt, %126, %127 : vector<1x128xi32>
    %129 = arith.andi %124, %128 : vector<1x128xi1>
    %c0_i32_56 = arith.constant 0 : i32
    %130 = vector.broadcast %c0_i32_56 : i32 to vector<1x128xi32>
    %131 = arith.addi %1, %130 : vector<1x128xi32>
    %c0_i32_57 = arith.constant 0 : i32
    %132 = vector.broadcast %c0_i32_57 : i32 to vector<1x128xi32>
    %133 = arith.cmpi sge, %131, %132 : vector<1x128xi32>
    %134 = arith.andi %129, %133 : vector<1x128xi1>
    %c0_i32_58 = arith.constant 0 : i32
    %135 = vector.broadcast %c0_i32_58 : i32 to vector<1x128xi32>
    %136 = arith.addi %1, %135 : vector<1x128xi32>
    %c8_i32_59 = arith.constant 8 : i32
    %137 = vector.broadcast %c8_i32_59 : i32 to vector<1x128xi32>
    %138 = arith.cmpi slt, %136, %137 : vector<1x128xi32>
    %139 = arith.andi %134, %138 : vector<1x128xi1>
    %cst_60 = arith.constant 0.000000e+00 : f32
    %140 = vector.shape_cast %139 : vector<1x128xi1> to vector<1x128xi1>
    %141 = vector.broadcast %140 : vector<1x128xi1> to vector<16x128xi1>
    %142 = vector.broadcast %cst_60 : f32 to vector<16x128xf32>
    %143 = arith.select %141, %3, %142 : vector<16x128xi1>, vector<16x128xf32>
    %144 = arith.truncf %143 : vector<16x128xf32> to vector<16x128xbf16>
    %c4 = arith.constant 4 : index
    %c0_61 = arith.constant 0 : index
    %c0_62 = arith.constant 0 : index
    %145 = vector.load %arg4[%c4, %c0_61, %c0_62] : memref<9x16x16xbf16, #tpu.memory_space<vmem>>, vector<1x16x16xbf16>
    %146 = vector.shape_cast %145 : vector<1x16x16xbf16> to vector<16x16xbf16>
    %cst_63 = arith.constant dense<0.000000e+00> : vector<16x128xf32>
    %147 = tpu.matmul %146, %144, %cst_63 {dimension_numbers = #tpu.dot_dimension_numbers<[1], [0], [0], [1], [0, 0, 1, 1], [], []>} : vector<16x16xbf16>, vector<16x128xbf16>, vector<16x128xf32> -> vector<16x128xf32>
    %148 = arith.addf %120, %147 : vector<16x128xf32>
    %c127_i32 = arith.constant 127 : i32
    %149 = tpu.dynamic_rotate %3 by %c127_i32 dim 1 : vector<16x128xf32>, i32 -> vector<16x128xf32>
    %c0_i32_64 = arith.constant 0 : i32
    %150 = vector.broadcast %c0_i32_64 : i32 to vector<1x128xi32>
    %151 = arith.addi %0, %150 : vector<1x128xi32>
    %c0_i32_65 = arith.constant 0 : i32
    %152 = vector.broadcast %c0_i32_65 : i32 to vector<1x128xi32>
    %153 = arith.cmpi sge, %151, %152 : vector<1x128xi32>
    %c0_i32_66 = arith.constant 0 : i32
    %154 = vector.broadcast %c0_i32_66 : i32 to vector<1x128xi32>
    %155 = arith.addi %0, %154 : vector<1x128xi32>
    %c8_i32_67 = arith.constant 8 : i32
    %156 = vector.broadcast %c8_i32_67 : i32 to vector<1x128xi32>
    %157 = arith.cmpi slt, %155, %156 : vector<1x128xi32>
    %158 = arith.andi %153, %157 : vector<1x128xi1>
    %c1_i32_68 = arith.constant 1 : i32
    %159 = vector.broadcast %c1_i32_68 : i32 to vector<1x128xi32>
    %160 = arith.addi %1, %159 : vector<1x128xi32>
    %c0_i32_69 = arith.constant 0 : i32
    %161 = vector.broadcast %c0_i32_69 : i32 to vector<1x128xi32>
    %162 = arith.cmpi sge, %160, %161 : vector<1x128xi32>
    %163 = arith.andi %158, %162 : vector<1x128xi1>
    %c1_i32_70 = arith.constant 1 : i32
    %164 = vector.broadcast %c1_i32_70 : i32 to vector<1x128xi32>
    %165 = arith.addi %1, %164 : vector<1x128xi32>
    %c8_i32_71 = arith.constant 8 : i32
    %166 = vector.broadcast %c8_i32_71 : i32 to vector<1x128xi32>
    %167 = arith.cmpi slt, %165, %166 : vector<1x128xi32>
    %168 = arith.andi %163, %167 : vector<1x128xi1>
    %cst_72 = arith.constant 0.000000e+00 : f32
    %169 = vector.shape_cast %168 : vector<1x128xi1> to vector<1x128xi1>
    %170 = vector.broadcast %169 : vector<1x128xi1> to vector<16x128xi1>
    %171 = vector.broadcast %cst_72 : f32 to vector<16x128xf32>
    %172 = arith.select %170, %149, %171 : vector<16x128xi1>, vector<16x128xf32>
    %173 = arith.truncf %172 : vector<16x128xf32> to vector<16x128xbf16>
    %c5 = arith.constant 5 : index
    %c0_73 = arith.constant 0 : index
    %c0_74 = arith.constant 0 : index
    %174 = vector.load %arg4[%c5, %c0_73, %c0_74] : memref<9x16x16xbf16, #tpu.memory_space<vmem>>, vector<1x16x16xbf16>
    %175 = vector.shape_cast %174 : vector<1x16x16xbf16> to vector<16x16xbf16>
    %cst_75 = arith.constant dense<0.000000e+00> : vector<16x128xf32>
    %176 = tpu.matmul %175, %173, %cst_75 {dimension_numbers = #tpu.dot_dimension_numbers<[1], [0], [0], [1], [0, 0, 1, 1], [], []>} : vector<16x16xbf16>, vector<16x128xbf16>, vector<16x128xf32> -> vector<16x128xf32>
    %177 = arith.addf %148, %176 : vector<16x128xf32>
    %c121_i32 = arith.constant 121 : i32
    %178 = tpu.dynamic_rotate %3 by %c121_i32 dim 1 : vector<16x128xf32>, i32 -> vector<16x128xf32>
    %c1_i32_76 = arith.constant 1 : i32
    %179 = vector.broadcast %c1_i32_76 : i32 to vector<1x128xi32>
    %180 = arith.addi %0, %179 : vector<1x128xi32>
    %c0_i32_77 = arith.constant 0 : i32
    %181 = vector.broadcast %c0_i32_77 : i32 to vector<1x128xi32>
    %182 = arith.cmpi sge, %180, %181 : vector<1x128xi32>
    %c1_i32_78 = arith.constant 1 : i32
    %183 = vector.broadcast %c1_i32_78 : i32 to vector<1x128xi32>
    %184 = arith.addi %0, %183 : vector<1x128xi32>
    %c8_i32_79 = arith.constant 8 : i32
    %185 = vector.broadcast %c8_i32_79 : i32 to vector<1x128xi32>
    %186 = arith.cmpi slt, %184, %185 : vector<1x128xi32>
    %187 = arith.andi %182, %186 : vector<1x128xi1>
    %c-1_i32_80 = arith.constant -1 : i32
    %188 = vector.broadcast %c-1_i32_80 : i32 to vector<1x128xi32>
    %189 = arith.addi %1, %188 : vector<1x128xi32>
    %c0_i32_81 = arith.constant 0 : i32
    %190 = vector.broadcast %c0_i32_81 : i32 to vector<1x128xi32>
    %191 = arith.cmpi sge, %189, %190 : vector<1x128xi32>
    %192 = arith.andi %187, %191 : vector<1x128xi1>
    %c-1_i32_82 = arith.constant -1 : i32
    %193 = vector.broadcast %c-1_i32_82 : i32 to vector<1x128xi32>
    %194 = arith.addi %1, %193 : vector<1x128xi32>
    %c8_i32_83 = arith.constant 8 : i32
    %195 = vector.broadcast %c8_i32_83 : i32 to vector<1x128xi32>
    %196 = arith.cmpi slt, %194, %195 : vector<1x128xi32>
    %197 = arith.andi %192, %196 : vector<1x128xi1>
    %cst_84 = arith.constant 0.000000e+00 : f32
    %198 = vector.shape_cast %197 : vector<1x128xi1> to vector<1x128xi1>
    %199 = vector.broadcast %198 : vector<1x128xi1> to vector<16x128xi1>
    %200 = vector.broadcast %cst_84 : f32 to vector<16x128xf32>
    %201 = arith.select %199, %178, %200 : vector<16x128xi1>, vector<16x128xf32>
    %202 = arith.truncf %201 : vector<16x128xf32> to vector<16x128xbf16>
    %c6 = arith.constant 6 : index
    %c0_85 = arith.constant 0 : index
    %c0_86 = arith.constant 0 : index
    %203 = vector.load %arg4[%c6, %c0_85, %c0_86] : memref<9x16x16xbf16, #tpu.memory_space<vmem>>, vector<1x16x16xbf16>
    %204 = vector.shape_cast %203 : vector<1x16x16xbf16> to vector<16x16xbf16>
    %cst_87 = arith.constant dense<0.000000e+00> : vector<16x128xf32>
    %205 = tpu.matmul %204, %202, %cst_87 {dimension_numbers = #tpu.dot_dimension_numbers<[1], [0], [0], [1], [0, 0, 1, 1], [], []>} : vector<16x16xbf16>, vector<16x128xbf16>, vector<16x128xf32> -> vector<16x128xf32>
    %206 = arith.addf %177, %205 : vector<16x128xf32>
    %c120_i32 = arith.constant 120 : i32
    %207 = tpu.dynamic_rotate %3 by %c120_i32 dim 1 : vector<16x128xf32>, i32 -> vector<16x128xf32>
    %c1_i32_88 = arith.constant 1 : i32
    %208 = vector.broadcast %c1_i32_88 : i32 to vector<1x128xi32>
    %209 = arith.addi %0, %208 : vector<1x128xi32>
    %c0_i32_89 = arith.constant 0 : i32
    %210 = vector.broadcast %c0_i32_89 : i32 to vector<1x128xi32>
    %211 = arith.cmpi sge, %209, %210 : vector<1x128xi32>
    %c1_i32_90 = arith.constant 1 : i32
    %212 = vector.broadcast %c1_i32_90 : i32 to vector<1x128xi32>
    %213 = arith.addi %0, %212 : vector<1x128xi32>
    %c8_i32_91 = arith.constant 8 : i32
    %214 = vector.broadcast %c8_i32_91 : i32 to vector<1x128xi32>
    %215 = arith.cmpi slt, %213, %214 : vector<1x128xi32>
    %216 = arith.andi %211, %215 : vector<1x128xi1>
    %c0_i32_92 = arith.constant 0 : i32
    %217 = vector.broadcast %c0_i32_92 : i32 to vector<1x128xi32>
    %218 = arith.addi %1, %217 : vector<1x128xi32>
    %c0_i32_93 = arith.constant 0 : i32
    %219 = vector.broadcast %c0_i32_93 : i32 to vector<1x128xi32>
    %220 = arith.cmpi sge, %218, %219 : vector<1x128xi32>
    %221 = arith.andi %216, %220 : vector<1x128xi1>
    %c0_i32_94 = arith.constant 0 : i32
    %222 = vector.broadcast %c0_i32_94 : i32 to vector<1x128xi32>
    %223 = arith.addi %1, %222 : vector<1x128xi32>
    %c8_i32_95 = arith.constant 8 : i32
    %224 = vector.broadcast %c8_i32_95 : i32 to vector<1x128xi32>
    %225 = arith.cmpi slt, %223, %224 : vector<1x128xi32>
    %226 = arith.andi %221, %225 : vector<1x128xi1>
    %cst_96 = arith.constant 0.000000e+00 : f32
    %227 = vector.shape_cast %226 : vector<1x128xi1> to vector<1x128xi1>
    %228 = vector.broadcast %227 : vector<1x128xi1> to vector<16x128xi1>
    %229 = vector.broadcast %cst_96 : f32 to vector<16x128xf32>
    %230 = arith.select %228, %207, %229 : vector<16x128xi1>, vector<16x128xf32>
    %231 = arith.truncf %230 : vector<16x128xf32> to vector<16x128xbf16>
    %c7 = arith.constant 7 : index
    %c0_97 = arith.constant 0 : index
    %c0_98 = arith.constant 0 : index
    %232 = vector.load %arg4[%c7, %c0_97, %c0_98] : memref<9x16x16xbf16, #tpu.memory_space<vmem>>, vector<1x16x16xbf16>
    %233 = vector.shape_cast %232 : vector<1x16x16xbf16> to vector<16x16xbf16>
    %cst_99 = arith.constant dense<0.000000e+00> : vector<16x128xf32>
    %234 = tpu.matmul %233, %231, %cst_99 {dimension_numbers = #tpu.dot_dimension_numbers<[1], [0], [0], [1], [0, 0, 1, 1], [], []>} : vector<16x16xbf16>, vector<16x128xbf16>, vector<16x128xf32> -> vector<16x128xf32>
    %235 = arith.addf %206, %234 : vector<16x128xf32>
    %c119_i32 = arith.constant 119 : i32
    %236 = tpu.dynamic_rotate %3 by %c119_i32 dim 1 : vector<16x128xf32>, i32 -> vector<16x128xf32>
    %c1_i32_100 = arith.constant 1 : i32
    %237 = vector.broadcast %c1_i32_100 : i32 to vector<1x128xi32>
    %238 = arith.addi %0, %237 : vector<1x128xi32>
    %c0_i32_101 = arith.constant 0 : i32
    %239 = vector.broadcast %c0_i32_101 : i32 to vector<1x128xi32>
    %240 = arith.cmpi sge, %238, %239 : vector<1x128xi32>
    %c1_i32_102 = arith.constant 1 : i32
    %241 = vector.broadcast %c1_i32_102 : i32 to vector<1x128xi32>
    %242 = arith.addi %0, %241 : vector<1x128xi32>
    %c8_i32_103 = arith.constant 8 : i32
    %243 = vector.broadcast %c8_i32_103 : i32 to vector<1x128xi32>
    %244 = arith.cmpi slt, %242, %243 : vector<1x128xi32>
    %245 = arith.andi %240, %244 : vector<1x128xi1>
    %c1_i32_104 = arith.constant 1 : i32
    %246 = vector.broadcast %c1_i32_104 : i32 to vector<1x128xi32>
    %247 = arith.addi %1, %246 : vector<1x128xi32>
    %c0_i32_105 = arith.constant 0 : i32
    %248 = vector.broadcast %c0_i32_105 : i32 to vector<1x128xi32>
    %249 = arith.cmpi sge, %247, %248 : vector<1x128xi32>
    %250 = arith.andi %245, %249 : vector<1x128xi1>
    %c1_i32_106 = arith.constant 1 : i32
    %251 = vector.broadcast %c1_i32_106 : i32 to vector<1x128xi32>
    %252 = arith.addi %1, %251 : vector<1x128xi32>
    %c8_i32_107 = arith.constant 8 : i32
    %253 = vector.broadcast %c8_i32_107 : i32 to vector<1x128xi32>
    %254 = arith.cmpi slt, %252, %253 : vector<1x128xi32>
    %255 = arith.andi %250, %254 : vector<1x128xi1>
    %cst_108 = arith.constant 0.000000e+00 : f32
    %256 = vector.shape_cast %255 : vector<1x128xi1> to vector<1x128xi1>
    %257 = vector.broadcast %256 : vector<1x128xi1> to vector<16x128xi1>
    %258 = vector.broadcast %cst_108 : f32 to vector<16x128xf32>
    %259 = arith.select %257, %236, %258 : vector<16x128xi1>, vector<16x128xf32>
    %260 = arith.truncf %259 : vector<16x128xf32> to vector<16x128xbf16>
    %c8 = arith.constant 8 : index
    %c0_109 = arith.constant 0 : index
    %c0_110 = arith.constant 0 : index
    %261 = vector.load %arg4[%c8, %c0_109, %c0_110] : memref<9x16x16xbf16, #tpu.memory_space<vmem>>, vector<1x16x16xbf16>
    %262 = vector.shape_cast %261 : vector<1x16x16xbf16> to vector<16x16xbf16>
    %cst_111 = arith.constant dense<0.000000e+00> : vector<16x128xf32>
    %263 = tpu.matmul %262, %260, %cst_111 {dimension_numbers = #tpu.dot_dimension_numbers<[1], [0], [0], [1], [0, 0, 1, 1], [], []>} : vector<16x16xbf16>, vector<16x128xbf16>, vector<16x128xf32> -> vector<16x128xf32>
    %264 = arith.addf %235, %263 : vector<16x128xf32>
    %c0_112 = arith.constant 0 : index
    %c0_113 = arith.constant 0 : index
    %265 = vector.load %arg5[%c0_112, %c0_113] : memref<16x1xf32, #tpu.memory_space<vmem>>, vector<16x1xf32>
    %266 = vector.broadcast %265 : vector<16x1xf32> to vector<16x128xf32>
    %267 = arith.addf %264, %266 : vector<16x128xf32>
    %cst_114 = arith.constant 0.000000e+00 : f32
    %268 = vector.broadcast %cst_114 : f32 to vector<16x128xf32>
    %269 = arith.maximumf %267, %268 : vector<16x128xf32>
    %c9_i32_115 = arith.constant 9 : i32
    %270 = tpu.dynamic_rotate %269 by %c9_i32_115 dim 1 : vector<16x128xf32>, i32 -> vector<16x128xf32>
    %c-1_i32_116 = arith.constant -1 : i32
    %271 = vector.broadcast %c-1_i32_116 : i32 to vector<1x128xi32>
    %272 = arith.addi %0, %271 : vector<1x128xi32>
    %c0_i32_117 = arith.constant 0 : i32
    %273 = vector.broadcast %c0_i32_117 : i32 to vector<1x128xi32>
    %274 = arith.cmpi sge, %272, %273 : vector<1x128xi32>
    %c-1_i32_118 = arith.constant -1 : i32
    %275 = vector.broadcast %c-1_i32_118 : i32 to vector<1x128xi32>
    %276 = arith.addi %0, %275 : vector<1x128xi32>
    %c8_i32_119 = arith.constant 8 : i32
    %277 = vector.broadcast %c8_i32_119 : i32 to vector<1x128xi32>
    %278 = arith.cmpi slt, %276, %277 : vector<1x128xi32>
    %279 = arith.andi %274, %278 : vector<1x128xi1>
    %c-1_i32_120 = arith.constant -1 : i32
    %280 = vector.broadcast %c-1_i32_120 : i32 to vector<1x128xi32>
    %281 = arith.addi %1, %280 : vector<1x128xi32>
    %c0_i32_121 = arith.constant 0 : i32
    %282 = vector.broadcast %c0_i32_121 : i32 to vector<1x128xi32>
    %283 = arith.cmpi sge, %281, %282 : vector<1x128xi32>
    %284 = arith.andi %279, %283 : vector<1x128xi1>
    %c-1_i32_122 = arith.constant -1 : i32
    %285 = vector.broadcast %c-1_i32_122 : i32 to vector<1x128xi32>
    %286 = arith.addi %1, %285 : vector<1x128xi32>
    %c8_i32_123 = arith.constant 8 : i32
    %287 = vector.broadcast %c8_i32_123 : i32 to vector<1x128xi32>
    %288 = arith.cmpi slt, %286, %287 : vector<1x128xi32>
    %289 = arith.andi %284, %288 : vector<1x128xi1>
    %cst_124 = arith.constant 0.000000e+00 : f32
    %290 = vector.shape_cast %289 : vector<1x128xi1> to vector<1x128xi1>
    %291 = vector.broadcast %290 : vector<1x128xi1> to vector<16x128xi1>
    %292 = vector.broadcast %cst_124 : f32 to vector<16x128xf32>
    %293 = arith.select %291, %270, %292 : vector<16x128xi1>, vector<16x128xf32>
    %294 = arith.truncf %293 : vector<16x128xf32> to vector<16x128xbf16>
    %c0_125 = arith.constant 0 : index
    %c0_126 = arith.constant 0 : index
    %c0_127 = arith.constant 0 : index
    %295 = vector.load %arg6[%c0_125, %c0_126, %c0_127] : memref<9x16x16xbf16, #tpu.memory_space<vmem>>, vector<1x16x16xbf16>
    %296 = vector.shape_cast %295 : vector<1x16x16xbf16> to vector<16x16xbf16>
    %cst_128 = arith.constant dense<0.000000e+00> : vector<16x128xf32>
    %297 = tpu.matmul %296, %294, %cst_128 {dimension_numbers = #tpu.dot_dimension_numbers<[1], [0], [0], [1], [0, 0, 1, 1], [], []>} : vector<16x16xbf16>, vector<16x128xbf16>, vector<16x128xf32> -> vector<16x128xf32>
    %298 = arith.addf %4, %297 : vector<16x128xf32>
    %c8_i32_129 = arith.constant 8 : i32
    %299 = tpu.dynamic_rotate %269 by %c8_i32_129 dim 1 : vector<16x128xf32>, i32 -> vector<16x128xf32>
    %c-1_i32_130 = arith.constant -1 : i32
    %300 = vector.broadcast %c-1_i32_130 : i32 to vector<1x128xi32>
    %301 = arith.addi %0, %300 : vector<1x128xi32>
    %c0_i32_131 = arith.constant 0 : i32
    %302 = vector.broadcast %c0_i32_131 : i32 to vector<1x128xi32>
    %303 = arith.cmpi sge, %301, %302 : vector<1x128xi32>
    %c-1_i32_132 = arith.constant -1 : i32
    %304 = vector.broadcast %c-1_i32_132 : i32 to vector<1x128xi32>
    %305 = arith.addi %0, %304 : vector<1x128xi32>
    %c8_i32_133 = arith.constant 8 : i32
    %306 = vector.broadcast %c8_i32_133 : i32 to vector<1x128xi32>
    %307 = arith.cmpi slt, %305, %306 : vector<1x128xi32>
    %308 = arith.andi %303, %307 : vector<1x128xi1>
    %c0_i32_134 = arith.constant 0 : i32
    %309 = vector.broadcast %c0_i32_134 : i32 to vector<1x128xi32>
    %310 = arith.addi %1, %309 : vector<1x128xi32>
    %c0_i32_135 = arith.constant 0 : i32
    %311 = vector.broadcast %c0_i32_135 : i32 to vector<1x128xi32>
    %312 = arith.cmpi sge, %310, %311 : vector<1x128xi32>
    %313 = arith.andi %308, %312 : vector<1x128xi1>
    %c0_i32_136 = arith.constant 0 : i32
    %314 = vector.broadcast %c0_i32_136 : i32 to vector<1x128xi32>
    %315 = arith.addi %1, %314 : vector<1x128xi32>
    %c8_i32_137 = arith.constant 8 : i32
    %316 = vector.broadcast %c8_i32_137 : i32 to vector<1x128xi32>
    %317 = arith.cmpi slt, %315, %316 : vector<1x128xi32>
    %318 = arith.andi %313, %317 : vector<1x128xi1>
    %cst_138 = arith.constant 0.000000e+00 : f32
    %319 = vector.shape_cast %318 : vector<1x128xi1> to vector<1x128xi1>
    %320 = vector.broadcast %319 : vector<1x128xi1> to vector<16x128xi1>
    %321 = vector.broadcast %cst_138 : f32 to vector<16x128xf32>
    %322 = arith.select %320, %299, %321 : vector<16x128xi1>, vector<16x128xf32>
    %323 = arith.truncf %322 : vector<16x128xf32> to vector<16x128xbf16>
    %c1_139 = arith.constant 1 : index
    %c0_140 = arith.constant 0 : index
    %c0_141 = arith.constant 0 : index
    %324 = vector.load %arg6[%c1_139, %c0_140, %c0_141] : memref<9x16x16xbf16, #tpu.memory_space<vmem>>, vector<1x16x16xbf16>
    %325 = vector.shape_cast %324 : vector<1x16x16xbf16> to vector<16x16xbf16>
    %cst_142 = arith.constant dense<0.000000e+00> : vector<16x128xf32>
    %326 = tpu.matmul %325, %323, %cst_142 {dimension_numbers = #tpu.dot_dimension_numbers<[1], [0], [0], [1], [0, 0, 1, 1], [], []>} : vector<16x16xbf16>, vector<16x128xbf16>, vector<16x128xf32> -> vector<16x128xf32>
    %327 = arith.addf %298, %326 : vector<16x128xf32>
    %c7_i32_143 = arith.constant 7 : i32
    %328 = tpu.dynamic_rotate %269 by %c7_i32_143 dim 1 : vector<16x128xf32>, i32 -> vector<16x128xf32>
    %c-1_i32_144 = arith.constant -1 : i32
    %329 = vector.broadcast %c-1_i32_144 : i32 to vector<1x128xi32>
    %330 = arith.addi %0, %329 : vector<1x128xi32>
    %c0_i32_145 = arith.constant 0 : i32
    %331 = vector.broadcast %c0_i32_145 : i32 to vector<1x128xi32>
    %332 = arith.cmpi sge, %330, %331 : vector<1x128xi32>
    %c-1_i32_146 = arith.constant -1 : i32
    %333 = vector.broadcast %c-1_i32_146 : i32 to vector<1x128xi32>
    %334 = arith.addi %0, %333 : vector<1x128xi32>
    %c8_i32_147 = arith.constant 8 : i32
    %335 = vector.broadcast %c8_i32_147 : i32 to vector<1x128xi32>
    %336 = arith.cmpi slt, %334, %335 : vector<1x128xi32>
    %337 = arith.andi %332, %336 : vector<1x128xi1>
    %c1_i32_148 = arith.constant 1 : i32
    %338 = vector.broadcast %c1_i32_148 : i32 to vector<1x128xi32>
    %339 = arith.addi %1, %338 : vector<1x128xi32>
    %c0_i32_149 = arith.constant 0 : i32
    %340 = vector.broadcast %c0_i32_149 : i32 to vector<1x128xi32>
    %341 = arith.cmpi sge, %339, %340 : vector<1x128xi32>
    %342 = arith.andi %337, %341 : vector<1x128xi1>
    %c1_i32_150 = arith.constant 1 : i32
    %343 = vector.broadcast %c1_i32_150 : i32 to vector<1x128xi32>
    %344 = arith.addi %1, %343 : vector<1x128xi32>
    %c8_i32_151 = arith.constant 8 : i32
    %345 = vector.broadcast %c8_i32_151 : i32 to vector<1x128xi32>
    %346 = arith.cmpi slt, %344, %345 : vector<1x128xi32>
    %347 = arith.andi %342, %346 : vector<1x128xi1>
    %cst_152 = arith.constant 0.000000e+00 : f32
    %348 = vector.shape_cast %347 : vector<1x128xi1> to vector<1x128xi1>
    %349 = vector.broadcast %348 : vector<1x128xi1> to vector<16x128xi1>
    %350 = vector.broadcast %cst_152 : f32 to vector<16x128xf32>
    %351 = arith.select %349, %328, %350 : vector<16x128xi1>, vector<16x128xf32>
    %352 = arith.truncf %351 : vector<16x128xf32> to vector<16x128xbf16>
    %c2_153 = arith.constant 2 : index
    %c0_154 = arith.constant 0 : index
    %c0_155 = arith.constant 0 : index
    %353 = vector.load %arg6[%c2_153, %c0_154, %c0_155] : memref<9x16x16xbf16, #tpu.memory_space<vmem>>, vector<1x16x16xbf16>
    %354 = vector.shape_cast %353 : vector<1x16x16xbf16> to vector<16x16xbf16>
    %cst_156 = arith.constant dense<0.000000e+00> : vector<16x128xf32>
    %355 = tpu.matmul %354, %352, %cst_156 {dimension_numbers = #tpu.dot_dimension_numbers<[1], [0], [0], [1], [0, 0, 1, 1], [], []>} : vector<16x16xbf16>, vector<16x128xbf16>, vector<16x128xf32> -> vector<16x128xf32>
    %356 = arith.addf %327, %355 : vector<16x128xf32>
    %c1_i32_157 = arith.constant 1 : i32
    %357 = tpu.dynamic_rotate %269 by %c1_i32_157 dim 1 : vector<16x128xf32>, i32 -> vector<16x128xf32>
    %c0_i32_158 = arith.constant 0 : i32
    %358 = vector.broadcast %c0_i32_158 : i32 to vector<1x128xi32>
    %359 = arith.addi %0, %358 : vector<1x128xi32>
    %c0_i32_159 = arith.constant 0 : i32
    %360 = vector.broadcast %c0_i32_159 : i32 to vector<1x128xi32>
    %361 = arith.cmpi sge, %359, %360 : vector<1x128xi32>
    %c0_i32_160 = arith.constant 0 : i32
    %362 = vector.broadcast %c0_i32_160 : i32 to vector<1x128xi32>
    %363 = arith.addi %0, %362 : vector<1x128xi32>
    %c8_i32_161 = arith.constant 8 : i32
    %364 = vector.broadcast %c8_i32_161 : i32 to vector<1x128xi32>
    %365 = arith.cmpi slt, %363, %364 : vector<1x128xi32>
    %366 = arith.andi %361, %365 : vector<1x128xi1>
    %c-1_i32_162 = arith.constant -1 : i32
    %367 = vector.broadcast %c-1_i32_162 : i32 to vector<1x128xi32>
    %368 = arith.addi %1, %367 : vector<1x128xi32>
    %c0_i32_163 = arith.constant 0 : i32
    %369 = vector.broadcast %c0_i32_163 : i32 to vector<1x128xi32>
    %370 = arith.cmpi sge, %368, %369 : vector<1x128xi32>
    %371 = arith.andi %366, %370 : vector<1x128xi1>
    %c-1_i32_164 = arith.constant -1 : i32
    %372 = vector.broadcast %c-1_i32_164 : i32 to vector<1x128xi32>
    %373 = arith.addi %1, %372 : vector<1x128xi32>
    %c8_i32_165 = arith.constant 8 : i32
    %374 = vector.broadcast %c8_i32_165 : i32 to vector<1x128xi32>
    %375 = arith.cmpi slt, %373, %374 : vector<1x128xi32>
    %376 = arith.andi %371, %375 : vector<1x128xi1>
    %cst_166 = arith.constant 0.000000e+00 : f32
    %377 = vector.shape_cast %376 : vector<1x128xi1> to vector<1x128xi1>
    %378 = vector.broadcast %377 : vector<1x128xi1> to vector<16x128xi1>
    %379 = vector.broadcast %cst_166 : f32 to vector<16x128xf32>
    %380 = arith.select %378, %357, %379 : vector<16x128xi1>, vector<16x128xf32>
    %381 = arith.truncf %380 : vector<16x128xf32> to vector<16x128xbf16>
    %c3_167 = arith.constant 3 : index
    %c0_168 = arith.constant 0 : index
    %c0_169 = arith.constant 0 : index
    %382 = vector.load %arg6[%c3_167, %c0_168, %c0_169] : memref<9x16x16xbf16, #tpu.memory_space<vmem>>, vector<1x16x16xbf16>
    %383 = vector.shape_cast %382 : vector<1x16x16xbf16> to vector<16x16xbf16>
    %cst_170 = arith.constant dense<0.000000e+00> : vector<16x128xf32>
    %384 = tpu.matmul %383, %381, %cst_170 {dimension_numbers = #tpu.dot_dimension_numbers<[1], [0], [0], [1], [0, 0, 1, 1], [], []>} : vector<16x16xbf16>, vector<16x128xbf16>, vector<16x128xf32> -> vector<16x128xf32>
    %385 = arith.addf %356, %384 : vector<16x128xf32>
    %c0_i32_171 = arith.constant 0 : i32
    %386 = vector.broadcast %c0_i32_171 : i32 to vector<1x128xi32>
    %387 = arith.addi %0, %386 : vector<1x128xi32>
    %c0_i32_172 = arith.constant 0 : i32
    %388 = vector.broadcast %c0_i32_172 : i32 to vector<1x128xi32>
    %389 = arith.cmpi sge, %387, %388 : vector<1x128xi32>
    %c0_i32_173 = arith.constant 0 : i32
    %390 = vector.broadcast %c0_i32_173 : i32 to vector<1x128xi32>
    %391 = arith.addi %0, %390 : vector<1x128xi32>
    %c8_i32_174 = arith.constant 8 : i32
    %392 = vector.broadcast %c8_i32_174 : i32 to vector<1x128xi32>
    %393 = arith.cmpi slt, %391, %392 : vector<1x128xi32>
    %394 = arith.andi %389, %393 : vector<1x128xi1>
    %c0_i32_175 = arith.constant 0 : i32
    %395 = vector.broadcast %c0_i32_175 : i32 to vector<1x128xi32>
    %396 = arith.addi %1, %395 : vector<1x128xi32>
    %c0_i32_176 = arith.constant 0 : i32
    %397 = vector.broadcast %c0_i32_176 : i32 to vector<1x128xi32>
    %398 = arith.cmpi sge, %396, %397 : vector<1x128xi32>
    %399 = arith.andi %394, %398 : vector<1x128xi1>
    %c0_i32_177 = arith.constant 0 : i32
    %400 = vector.broadcast %c0_i32_177 : i32 to vector<1x128xi32>
    %401 = arith.addi %1, %400 : vector<1x128xi32>
    %c8_i32_178 = arith.constant 8 : i32
    %402 = vector.broadcast %c8_i32_178 : i32 to vector<1x128xi32>
    %403 = arith.cmpi slt, %401, %402 : vector<1x128xi32>
    %404 = arith.andi %399, %403 : vector<1x128xi1>
    %cst_179 = arith.constant 0.000000e+00 : f32
    %405 = vector.shape_cast %404 : vector<1x128xi1> to vector<1x128xi1>
    %406 = vector.broadcast %405 : vector<1x128xi1> to vector<16x128xi1>
    %407 = vector.broadcast %cst_179 : f32 to vector<16x128xf32>
    %408 = arith.select %406, %269, %407 : vector<16x128xi1>, vector<16x128xf32>
    %409 = arith.truncf %408 : vector<16x128xf32> to vector<16x128xbf16>
    %c4_180 = arith.constant 4 : index
    %c0_181 = arith.constant 0 : index
    %c0_182 = arith.constant 0 : index
    %410 = vector.load %arg6[%c4_180, %c0_181, %c0_182] : memref<9x16x16xbf16, #tpu.memory_space<vmem>>, vector<1x16x16xbf16>
    %411 = vector.shape_cast %410 : vector<1x16x16xbf16> to vector<16x16xbf16>
    %cst_183 = arith.constant dense<0.000000e+00> : vector<16x128xf32>
    %412 = tpu.matmul %411, %409, %cst_183 {dimension_numbers = #tpu.dot_dimension_numbers<[1], [0], [0], [1], [0, 0, 1, 1], [], []>} : vector<16x16xbf16>, vector<16x128xbf16>, vector<16x128xf32> -> vector<16x128xf32>
    %413 = arith.addf %385, %412 : vector<16x128xf32>
    %c127_i32_184 = arith.constant 127 : i32
    %414 = tpu.dynamic_rotate %269 by %c127_i32_184 dim 1 : vector<16x128xf32>, i32 -> vector<16x128xf32>
    %c0_i32_185 = arith.constant 0 : i32
    %415 = vector.broadcast %c0_i32_185 : i32 to vector<1x128xi32>
    %416 = arith.addi %0, %415 : vector<1x128xi32>
    %c0_i32_186 = arith.constant 0 : i32
    %417 = vector.broadcast %c0_i32_186 : i32 to vector<1x128xi32>
    %418 = arith.cmpi sge, %416, %417 : vector<1x128xi32>
    %c0_i32_187 = arith.constant 0 : i32
    %419 = vector.broadcast %c0_i32_187 : i32 to vector<1x128xi32>
    %420 = arith.addi %0, %419 : vector<1x128xi32>
    %c8_i32_188 = arith.constant 8 : i32
    %421 = vector.broadcast %c8_i32_188 : i32 to vector<1x128xi32>
    %422 = arith.cmpi slt, %420, %421 : vector<1x128xi32>
    %423 = arith.andi %418, %422 : vector<1x128xi1>
    %c1_i32_189 = arith.constant 1 : i32
    %424 = vector.broadcast %c1_i32_189 : i32 to vector<1x128xi32>
    %425 = arith.addi %1, %424 : vector<1x128xi32>
    %c0_i32_190 = arith.constant 0 : i32
    %426 = vector.broadcast %c0_i32_190 : i32 to vector<1x128xi32>
    %427 = arith.cmpi sge, %425, %426 : vector<1x128xi32>
    %428 = arith.andi %423, %427 : vector<1x128xi1>
    %c1_i32_191 = arith.constant 1 : i32
    %429 = vector.broadcast %c1_i32_191 : i32 to vector<1x128xi32>
    %430 = arith.addi %1, %429 : vector<1x128xi32>
    %c8_i32_192 = arith.constant 8 : i32
    %431 = vector.broadcast %c8_i32_192 : i32 to vector<1x128xi32>
    %432 = arith.cmpi slt, %430, %431 : vector<1x128xi32>
    %433 = arith.andi %428, %432 : vector<1x128xi1>
    %cst_193 = arith.constant 0.000000e+00 : f32
    %434 = vector.shape_cast %433 : vector<1x128xi1> to vector<1x128xi1>
    %435 = vector.broadcast %434 : vector<1x128xi1> to vector<16x128xi1>
    %436 = vector.broadcast %cst_193 : f32 to vector<16x128xf32>
    %437 = arith.select %435, %414, %436 : vector<16x128xi1>, vector<16x128xf32>
    %438 = arith.truncf %437 : vector<16x128xf32> to vector<16x128xbf16>
    %c5_194 = arith.constant 5 : index
    %c0_195 = arith.constant 0 : index
    %c0_196 = arith.constant 0 : index
    %439 = vector.load %arg6[%c5_194, %c0_195, %c0_196] : memref<9x16x16xbf16, #tpu.memory_space<vmem>>, vector<1x16x16xbf16>
    %440 = vector.shape_cast %439 : vector<1x16x16xbf16> to vector<16x16xbf16>
    %cst_197 = arith.constant dense<0.000000e+00> : vector<16x128xf32>
    %441 = tpu.matmul %440, %438, %cst_197 {dimension_numbers = #tpu.dot_dimension_numbers<[1], [0], [0], [1], [0, 0, 1, 1], [], []>} : vector<16x16xbf16>, vector<16x128xbf16>, vector<16x128xf32> -> vector<16x128xf32>
    %442 = arith.addf %413, %441 : vector<16x128xf32>
    %c121_i32_198 = arith.constant 121 : i32
    %443 = tpu.dynamic_rotate %269 by %c121_i32_198 dim 1 : vector<16x128xf32>, i32 -> vector<16x128xf32>
    %c1_i32_199 = arith.constant 1 : i32
    %444 = vector.broadcast %c1_i32_199 : i32 to vector<1x128xi32>
    %445 = arith.addi %0, %444 : vector<1x128xi32>
    %c0_i32_200 = arith.constant 0 : i32
    %446 = vector.broadcast %c0_i32_200 : i32 to vector<1x128xi32>
    %447 = arith.cmpi sge, %445, %446 : vector<1x128xi32>
    %c1_i32_201 = arith.constant 1 : i32
    %448 = vector.broadcast %c1_i32_201 : i32 to vector<1x128xi32>
    %449 = arith.addi %0, %448 : vector<1x128xi32>
    %c8_i32_202 = arith.constant 8 : i32
    %450 = vector.broadcast %c8_i32_202 : i32 to vector<1x128xi32>
    %451 = arith.cmpi slt, %449, %450 : vector<1x128xi32>
    %452 = arith.andi %447, %451 : vector<1x128xi1>
    %c-1_i32_203 = arith.constant -1 : i32
    %453 = vector.broadcast %c-1_i32_203 : i32 to vector<1x128xi32>
    %454 = arith.addi %1, %453 : vector<1x128xi32>
    %c0_i32_204 = arith.constant 0 : i32
    %455 = vector.broadcast %c0_i32_204 : i32 to vector<1x128xi32>
    %456 = arith.cmpi sge, %454, %455 : vector<1x128xi32>
    %457 = arith.andi %452, %456 : vector<1x128xi1>
    %c-1_i32_205 = arith.constant -1 : i32
    %458 = vector.broadcast %c-1_i32_205 : i32 to vector<1x128xi32>
    %459 = arith.addi %1, %458 : vector<1x128xi32>
    %c8_i32_206 = arith.constant 8 : i32
    %460 = vector.broadcast %c8_i32_206 : i32 to vector<1x128xi32>
    %461 = arith.cmpi slt, %459, %460 : vector<1x128xi32>
    %462 = arith.andi %457, %461 : vector<1x128xi1>
    %cst_207 = arith.constant 0.000000e+00 : f32
    %463 = vector.shape_cast %462 : vector<1x128xi1> to vector<1x128xi1>
    %464 = vector.broadcast %463 : vector<1x128xi1> to vector<16x128xi1>
    %465 = vector.broadcast %cst_207 : f32 to vector<16x128xf32>
    %466 = arith.select %464, %443, %465 : vector<16x128xi1>, vector<16x128xf32>
    %467 = arith.truncf %466 : vector<16x128xf32> to vector<16x128xbf16>
    %c6_208 = arith.constant 6 : index
    %c0_209 = arith.constant 0 : index
    %c0_210 = arith.constant 0 : index
    %468 = vector.load %arg6[%c6_208, %c0_209, %c0_210] : memref<9x16x16xbf16, #tpu.memory_space<vmem>>, vector<1x16x16xbf16>
    %469 = vector.shape_cast %468 : vector<1x16x16xbf16> to vector<16x16xbf16>
    %cst_211 = arith.constant dense<0.000000e+00> : vector<16x128xf32>
    %470 = tpu.matmul %469, %467, %cst_211 {dimension_numbers = #tpu.dot_dimension_numbers<[1], [0], [0], [1], [0, 0, 1, 1], [], []>} : vector<16x16xbf16>, vector<16x128xbf16>, vector<16x128xf32> -> vector<16x128xf32>
    %471 = arith.addf %442, %470 : vector<16x128xf32>
    %c120_i32_212 = arith.constant 120 : i32
    %472 = tpu.dynamic_rotate %269 by %c120_i32_212 dim 1 : vector<16x128xf32>, i32 -> vector<16x128xf32>
    %c1_i32_213 = arith.constant 1 : i32
    %473 = vector.broadcast %c1_i32_213 : i32 to vector<1x128xi32>
    %474 = arith.addi %0, %473 : vector<1x128xi32>
    %c0_i32_214 = arith.constant 0 : i32
    %475 = vector.broadcast %c0_i32_214 : i32 to vector<1x128xi32>
    %476 = arith.cmpi sge, %474, %475 : vector<1x128xi32>
    %c1_i32_215 = arith.constant 1 : i32
    %477 = vector.broadcast %c1_i32_215 : i32 to vector<1x128xi32>
    %478 = arith.addi %0, %477 : vector<1x128xi32>
    %c8_i32_216 = arith.constant 8 : i32
    %479 = vector.broadcast %c8_i32_216 : i32 to vector<1x128xi32>
    %480 = arith.cmpi slt, %478, %479 : vector<1x128xi32>
    %481 = arith.andi %476, %480 : vector<1x128xi1>
    %c0_i32_217 = arith.constant 0 : i32
    %482 = vector.broadcast %c0_i32_217 : i32 to vector<1x128xi32>
    %483 = arith.addi %1, %482 : vector<1x128xi32>
    %c0_i32_218 = arith.constant 0 : i32
    %484 = vector.broadcast %c0_i32_218 : i32 to vector<1x128xi32>
    %485 = arith.cmpi sge, %483, %484 : vector<1x128xi32>
    %486 = arith.andi %481, %485 : vector<1x128xi1>
    %c0_i32_219 = arith.constant 0 : i32
    %487 = vector.broadcast %c0_i32_219 : i32 to vector<1x128xi32>
    %488 = arith.addi %1, %487 : vector<1x128xi32>
    %c8_i32_220 = arith.constant 8 : i32
    %489 = vector.broadcast %c8_i32_220 : i32 to vector<1x128xi32>
    %490 = arith.cmpi slt, %488, %489 : vector<1x128xi32>
    %491 = arith.andi %486, %490 : vector<1x128xi1>
    %cst_221 = arith.constant 0.000000e+00 : f32
    %492 = vector.shape_cast %491 : vector<1x128xi1> to vector<1x128xi1>
    %493 = vector.broadcast %492 : vector<1x128xi1> to vector<16x128xi1>
    %494 = vector.broadcast %cst_221 : f32 to vector<16x128xf32>
    %495 = arith.select %493, %472, %494 : vector<16x128xi1>, vector<16x128xf32>
    %496 = arith.truncf %495 : vector<16x128xf32> to vector<16x128xbf16>
    %c7_222 = arith.constant 7 : index
    %c0_223 = arith.constant 0 : index
    %c0_224 = arith.constant 0 : index
    %497 = vector.load %arg6[%c7_222, %c0_223, %c0_224] : memref<9x16x16xbf16, #tpu.memory_space<vmem>>, vector<1x16x16xbf16>
    %498 = vector.shape_cast %497 : vector<1x16x16xbf16> to vector<16x16xbf16>
    %cst_225 = arith.constant dense<0.000000e+00> : vector<16x128xf32>
    %499 = tpu.matmul %498, %496, %cst_225 {dimension_numbers = #tpu.dot_dimension_numbers<[1], [0], [0], [1], [0, 0, 1, 1], [], []>} : vector<16x16xbf16>, vector<16x128xbf16>, vector<16x128xf32> -> vector<16x128xf32>
    %500 = arith.addf %471, %499 : vector<16x128xf32>
    %c119_i32_226 = arith.constant 119 : i32
    %501 = tpu.dynamic_rotate %269 by %c119_i32_226 dim 1 : vector<16x128xf32>, i32 -> vector<16x128xf32>
    %c1_i32_227 = arith.constant 1 : i32
    %502 = vector.broadcast %c1_i32_227 : i32 to vector<1x128xi32>
    %503 = arith.addi %0, %502 : vector<1x128xi32>
    %c0_i32_228 = arith.constant 0 : i32
    %504 = vector.broadcast %c0_i32_228 : i32 to vector<1x128xi32>
    %505 = arith.cmpi sge, %503, %504 : vector<1x128xi32>
    %c1_i32_229 = arith.constant 1 : i32
    %506 = vector.broadcast %c1_i32_229 : i32 to vector<1x128xi32>
    %507 = arith.addi %0, %506 : vector<1x128xi32>
    %c8_i32_230 = arith.constant 8 : i32
    %508 = vector.broadcast %c8_i32_230 : i32 to vector<1x128xi32>
    %509 = arith.cmpi slt, %507, %508 : vector<1x128xi32>
    %510 = arith.andi %505, %509 : vector<1x128xi1>
    %c1_i32_231 = arith.constant 1 : i32
    %511 = vector.broadcast %c1_i32_231 : i32 to vector<1x128xi32>
    %512 = arith.addi %1, %511 : vector<1x128xi32>
    %c0_i32_232 = arith.constant 0 : i32
    %513 = vector.broadcast %c0_i32_232 : i32 to vector<1x128xi32>
    %514 = arith.cmpi sge, %512, %513 : vector<1x128xi32>
    %515 = arith.andi %510, %514 : vector<1x128xi1>
    %c1_i32_233 = arith.constant 1 : i32
    %516 = vector.broadcast %c1_i32_233 : i32 to vector<1x128xi32>
    %517 = arith.addi %1, %516 : vector<1x128xi32>
    %c8_i32_234 = arith.constant 8 : i32
    %518 = vector.broadcast %c8_i32_234 : i32 to vector<1x128xi32>
    %519 = arith.cmpi slt, %517, %518 : vector<1x128xi32>
    %520 = arith.andi %515, %519 : vector<1x128xi1>
    %cst_235 = arith.constant 0.000000e+00 : f32
    %521 = vector.shape_cast %520 : vector<1x128xi1> to vector<1x128xi1>
    %522 = vector.broadcast %521 : vector<1x128xi1> to vector<16x128xi1>
    %523 = vector.broadcast %cst_235 : f32 to vector<16x128xf32>
    %524 = arith.select %522, %501, %523 : vector<16x128xi1>, vector<16x128xf32>
    %525 = arith.truncf %524 : vector<16x128xf32> to vector<16x128xbf16>
    %c8_236 = arith.constant 8 : index
    %c0_237 = arith.constant 0 : index
    %c0_238 = arith.constant 0 : index
    %526 = vector.load %arg6[%c8_236, %c0_237, %c0_238] : memref<9x16x16xbf16, #tpu.memory_space<vmem>>, vector<1x16x16xbf16>
    %527 = vector.shape_cast %526 : vector<1x16x16xbf16> to vector<16x16xbf16>
    %cst_239 = arith.constant dense<0.000000e+00> : vector<16x128xf32>
    %528 = tpu.matmul %527, %525, %cst_239 {dimension_numbers = #tpu.dot_dimension_numbers<[1], [0], [0], [1], [0, 0, 1, 1], [], []>} : vector<16x16xbf16>, vector<16x128xbf16>, vector<16x128xf32> -> vector<16x128xf32>
    %529 = arith.addf %500, %528 : vector<16x128xf32>
    %c0_240 = arith.constant 0 : index
    %c0_241 = arith.constant 0 : index
    %530 = vector.load %arg7[%c0_240, %c0_241] : memref<16x1xf32, #tpu.memory_space<vmem>>, vector<16x1xf32>
    %531 = vector.broadcast %530 : vector<16x1xf32> to vector<16x128xf32>
    %532 = arith.addf %529, %531 : vector<16x128xf32>
    %533 = arith.addf %532, %3 : vector<16x128xf32>
    %cst_242 = arith.constant 0.000000e+00 : f32
    %534 = vector.broadcast %cst_242 : f32 to vector<16x128xf32>
    %535 = arith.maximumf %533, %534 : vector<16x128xf32>
    %c0_243 = arith.constant 0 : index
    %c0_244 = arith.constant 0 : index
    %536 = vector.load %arg8[%c0_243, %c0_244] : memref<16x128xf32, #tpu.memory_space<vmem>>, vector<16x128xf32>
    tpu.vector_store %arg8[%c0_243, %c0_244], %535 {strides = array<i32>} : memref<16x128xf32, #tpu.memory_space<vmem>>, vector<16x128xf32>,
    return
  }
  func.func @transform_0(%arg0: i32) -> (i32, i32) {
    %c0_i32 = arith.constant 0 : i32
    %c0_i32_0 = arith.constant 0 : i32
    %c0_i32_1 = arith.constant 0 : i32
    return %c0_i32, %c0_i32_0 : i32, i32
  }
  func.func @transform_1(%arg0: i32) -> (i32, i32) {
    %c0_i32 = arith.constant 0 : i32
    %c0_i32_0 = arith.constant 0 : i32
    %c0_i32_1 = arith.constant 0 : i32
    return %c0_i32, %c0_i32_0 : i32, i32
  }
  func.func @transform_2(%arg0: i32) -> (i32, i32) {
    %c0_i32 = arith.constant 0 : i32
    %c0_i32_0 = arith.constant 0 : i32
    return %c0_i32, %arg0 : i32, i32
  }
  func.func @transform_3(%arg0: i32) -> (i32, i32, i32) {
    %c0_i32 = arith.constant 0 : i32
    %c0_i32_0 = arith.constant 0 : i32
    %c0_i32_1 = arith.constant 0 : i32
    %c0_i32_2 = arith.constant 0 : i32
    return %c0_i32, %c0_i32_0, %c0_i32_1 : i32, i32, i32
  }
  func.func @transform_4(%arg0: i32) -> (i32, i32) {
    %c0_i32 = arith.constant 0 : i32
    %c0_i32_0 = arith.constant 0 : i32
    %c0_i32_1 = arith.constant 0 : i32
    return %c0_i32, %c0_i32_0 : i32, i32
  }
  func.func @transform_5(%arg0: i32) -> (i32, i32, i32) {
    %c0_i32 = arith.constant 0 : i32
    %c0_i32_0 = arith.constant 0 : i32
    %c0_i32_1 = arith.constant 0 : i32
    %c0_i32_2 = arith.constant 0 : i32
    return %c0_i32, %c0_i32_0, %c0_i32_1 : i32, i32, i32
  }
  func.func @transform_6(%arg0: i32) -> (i32, i32) {
    %c0_i32 = arith.constant 0 : i32
    %c0_i32_0 = arith.constant 0 : i32
    %c0_i32_1 = arith.constant 0 : i32
    return %c0_i32, %c0_i32_0 : i32, i32
  }
  func.func @transform_7(%arg0: i32) -> (i32, i32) {
    %c0_i32 = arith.constant 0 : i32
    %c0_i32_0 = arith.constant 0 : i32
    return %c0_i32, %arg0 : i32, i32
  }
}

</mosaic_0001>

<bundles_post_ra>
// kernel: _lambda_.2
= control target key start
LH: loop header
LB: loop body
LE: loop exit
PB: predicated region body
PF: predicated region fallthrough
CT: control target
= control target key end

     0   :  { %v1119_v0 = vmov 0.0   ;;  %vm1445_vm0 = vmmov 0   ;;  %v1121_v2 = vmov 0   ;;  %vm1444_vm1 = vcmask 1041408   ;;  %s1124_s24 = smov 120   ;;  %s1125_s25 = smov 8   ;;  %s1434_s2 = inlined_call_operand.vmem [shape: bf16[36,128], index: 2, kind: input, shape index: {}]   ;;  %s1435_s5 = inlined_call_operand.vmem [shape: f32[16,1], index: 5, kind: input, shape index: {}]   ;;  %s1436_s4 = inlined_call_operand.vmem [shape: bf16[16,36], index: 4, kind: input, shape index: {}]   ;;  %s1437_s6 = inlined_call_operand.vmem [shape: bf16[9,16,16], index: 6, kind: input, shape index: {}]   ;;  %s1438_s0 = inlined_call_operand.vmem [shape: s32[1,128], index: 0, kind: input, shape index: {}]   ;;  %s1439_s1 = inlined_call_operand.vmem [shape: s32[1,128], index: 1, kind: input, shape index: {}]   ;;  %s1440_s7 = inlined_call_operand.vmem [shape: f32[16,1], index: 7, kind: input, shape index: {}]   ;;  %s1441_s8 = inlined_call_operand.vmem [shape: bf16[16,4], index: 8, kind: input, shape index: {}]   ;;  %s1442_s3 = inlined_call_operand.vmem [shape: bf16[4,128], index: 3, kind: input, shape index: {}]   ;;  %s1443_s9 = inlined_call_operand.vmem [shape: bf16[16,128], index: 9, kind: output, shape index: {}]  }
   0x1   :  { %946 = vmatprep.subr.bf16.mxu0 %v1119_v0  ;;  %v1105_v1 = vld [vmem:[%s1434_s2] sm:$0xff]   ;;  %952 = vmatprep.mubr.msk.bf16.mxu0 %vm1445_vm0, %v1119_v0  ;;  %v1106_v3 = vld [vmem:[%s1434_s2 + $0x8] sm:$0xff]   ;;  %v1107_v4 = vld [vmem:[%s1434_s2 + $0x10] ss:$0 sps:$4 sm:$0x33]   ;;  %vm74_vm2 = vcmask 293888   ;;  %v139_v11 = vlaneseq }
   0x2   :  { %1063 = vset.pattern.permute.xlu0 %v1121_v2  ;;  %980 = vmatprep.subr.bf16.mxu1 %v1119_v0  ;;  %v42_v5 = vld [vmem:[%s1435_s5] sm:$0xff]  ;;  %v43_v6 = vld [vmem:[%s1435_s5 + $0x8] sm:$0xff]  ;;  %v80_v7 = vsel %vm1444_vm1, %v1107_v4, 0  ;;  %vm1447_vm12 = vcmask 130048   ;;  %s1126_s26 = smov 119   ;;  %s1127_s27 = smov 9  }
   0x3   :  { %947 = vmatpush3.bf16.msra.mxu0 %v1105_v1  ;;  %982 = vmatprep.mubr.msk.bf16.mxu1 %vm1445_vm0, %v1119_v0  ;;  %v1108_v8 = vld [vmem:[%s1436_s4] sm:$0xff]   ;;  %v140_v13 = vshrl.u32 %v139_v11, 7  ;;  %s1128_s30 = smov 7   ;;  %s1129_s10 = smov 1   ;;  %v758_v31 = vld [vmem:[%s1440_s7 + $0x8] sm:$0xff]  ;;  %v1117_v37 = vld [vmem:[%s1437_s6 + $0x18] sm:$0xff]  }
   0x4   :  { %948 = vmatprep.subr.bf16.mxu0 %v1119_v0  ;;  %1104 = vset.pattern.permute.xlu1 %v1121_v2  ;;  %v33_v9 = vld [vmem:[%s1438_s0] sm:$0x1]  ;;  %s1122_s0 = smov 121   ;;  %v1110_v57 = vld [vmem:[%s1437_s6 + $0x28] sm:$0xff]  }
   0x5   :  { %46 = vperm.xlu0 %1063, %v42_v5   ;;  %v1218_v10 = vld [vmem:[%s1439_s1] sm:$0x1]  ;;  %vm344_vm3 = vcmp.ge.s32.totalorder %v33_v9, 0  ;;  %vm345_vm4 = vcmp.lt.s32.totalorder %v33_v9, 8  ;;  %v1232_v15 = vsub.s32 0, %v140_v13  ;;  %s1123_s1 = smov 127  }
   0x6   :  { %vm153_vm5 = vcmp.ge.s32.totalorder %v1218_v10, 0  ;;  %vm1221_vm6 = vmand %vm344_vm3, %vm345_vm4  ;;  %vm155_vm7 = vcmp.lt.s32.totalorder %v1218_v10, 8  ;;  %v1109_v29 = vld [vmem:[%s1437_s6 + $0x20] sm:$0xff]   ;;  %v1250_v32 = vadd.s32 1, %v1218_v10  ;;  %v129_v33 = vadd.s32 4294967295, %v33_v9 }
   0x7   :  { %949 = vmatpush3.bf16.msra.mxu0 %v1106_v3  ;;  %vm412_vm8 = vmand %vm1221_vm6, %vm153_vm5  ;;  %v757_v30 = vld [vmem:[%s1440_s7] sm:$0xff]  ;;  %v550_v34 = vadd.s32 1, %v33_v9  ;;  %v1254_v35 = vadd.s32 4294967295, %v1218_v10  ;;  %v1111_v3 = vld [vmem:[%s1437_s6 + $0x8] sm:$0xff]  }
   0x8   :  { %950 = vmatprep.subr.bf16.mxu0 %v1119_v0  ;;  %vm413_vm9 = vmand %vm412_vm8, %vm155_vm7  ;;  %vm273_vm13 = vcmp.ge.s32.totalorder %v1250_v32, 0  ;;  %vm130_vm14 = vcmp.ge.s32.totalorder %v129_v33, 0  ;;  %vm131_vm15 = vcmp.lt.s32.totalorder %v129_v33, 8  ;;  %vm275_vm4 = vcmp.lt.s32.totalorder %v1250_v32, 8  ;;  %v1115_v33 = vld [vmem:[%s1437_s6 + $0x10] sm:$0xff]  }
   0x9   :  { %51 = vperm.xlu0 %1063, %v43_v6   ;;  %v414_v16 = vsel %vm413_vm9, 1, %v1121_v2  ;;  %vm552_vm3 = vcmp.lt.s32.totalorder %v550_v34, 8  ;;  %vm481_vm8 = vmand %vm1221_vm6, %vm273_vm13 }
   0xa   :  { %v418_v18 = vrot.slane %v414_v16, %v1232_v15  ;;  %vm1261_vm9 = vmand %vm130_vm14, %vm131_vm15 }
   0xb   :  { %951 = vmatpush3.bf16.msra.mxu0 %v80_v7  ;;  %vm482_vm1 = vmand %vm481_vm8, %vm275_vm4 }
   0xc   :  { %956 = vmatprep.subr.bf16.mxu0 %v1119_v0  ;;  %vm419_vm10 = vcmp.eq.s32.totalorder %v418_v18, 1  ;;  %v483_v38 = vsel %vm482_vm1, 1, %v1121_v2 }
   0xd   :  { %vm879_vm11 = vmpackc.low %vm419_vm10, %vm419_vm10  ;;  %vm134_vm10 = vcmp.ge.s32.totalorder %v1254_v35, 0  ;;  %v487_v40 = vrot.slane %v483_v38, %v1232_v15  ;;  %v1118_v38 = vld [vmem:[%s1441_s8] sm:$0xff]  }
   0xe   :  { %953 = vmatmul.mubr.msk.bf16.vlgmr.msra.gmra.mrb[0].mxu0 %vm74_vm2, %v1108_v8  ;;  %vm551_vm2 = vcmp.ge.s32.totalorder %v550_v34, 0  ;;  %v773_v34 = vld [vmem:[%s1442_s3] sm:$0x3] }
   0xf   :  { %958 = vmatprep.mubr.msk.bf16.mxu0 %vm1445_vm0, %v1119_v0  ;;  %vm1297_vm1 = vcmp.eq.s32.totalorder %v487_v40, 1 }
  0x84   :  { %v47_v14 = vpop.permute.xlu0 %46 }
  0x88   :  { %v52_v21 = vpop.permute.xlu0 %51 }
  0xe1   :  { %v116_v17 = vpop.f32.mrb[0].mxu0 }
  0xe2   :  { %v117_v19 = vadd.f32 %v116_v17, %v47_v14  ;;  %v954_v20 = vpop.f32.mrb[1].mxu0  ;;  %v1112_v17 = vld [vmem:[%s1437_s6 + $0x30] sm:$0xff]  }
  0xe3   :  { %v119_v22 = vpop.f32.mrb[2].mxu0 }
  0xe4   :  { %v120_v23 = vadd.f32 %v119_v22, %v52_v21  ;;  %v955_v24 = vpop.f32.mrb[3].mxu0  ;;  %v123_v25 = vmax.f32 %v117_v19, 0.0  ;;  %v1113_v21 = vld [vmem:[%s1437_s6] sm:$0xff]  }
  0xe6   :  { %v124_v26 = vmax.f32 %v120_v23, 0.0 }
  0xe8   :  { %v1074_v27 = vpack.i.bf16 %v124_v26, %v123_v25  ;;  %v880_v28 = vpack.c.bf16 %v124_v26, %v123_v25 }
  0xea   :  { %1075 = vrot.lane.b32.xlu0 %v1074_v27, %s1122_s0  ;;  %1065 = vrot.lane.b32.xlu1 %v1074_v27, %s1123_s1 }
  0xeb   :  { %981 = vmatpush3.bf16.msk.msra.mxu1 %vm879_vm11, %v880_v28  ;;  %vm1266_vm11 = vmand %vm551_vm2, %vm552_vm3 }
  0xec   :  { %986 = vmatprep.subr.bf16.mxu1 %v1119_v0  ;;  %vm554_vm14 = vmand %vm1266_vm11, %vm134_vm10 }
  0xed   :  { %vm135_vm3 = vmand %vm1261_vm9, %vm134_vm10 }
  0xee   :  { %1085 = vrot.lane.b32.xlu0 %v1074_v27, %s1124_s24  ;;  %1070 = vrot.lane.b32.xlu1 %v1074_v27, %s1125_s25  ;;  %vm623_vm8 = vmand %vm1266_vm11, %vm153_vm5 }
  0xef   :  { %983 = vmatmul.mubr.msk.bf16.vlgmr.msra.gmra.mrb[0].mxu1 %vm1447_vm12, %v1109_v29  ;;  %vm136_vm12 = vcmp.lt.s32.totalorder %v1254_v35, 8  ;;  %v1116_v35 = vld [vmem:[%s1437_s6 + $0x40] sm:$0xff]  }
  0xf0   :  { %988 = vmatprep.mubr.msk.bf16.mxu1 %vm1445_vm0, %v1119_v0  ;;  %vm154_vm0 = vmand %vm1261_vm9, %vm153_vm5 }
  0xf1   :  { %vm156_vm15 = vmand %vm154_vm0, %vm155_vm7 }
  0xf2   :  { %1095 = vrot.lane.b32.xlu0 %v1074_v27, %s1126_s26  ;;  %1080 = vrot.lane.b32.xlu1 %v1074_v27, %s1127_s27  ;;  %vm555_vm2 = vmand %vm554_vm14, %vm136_vm12  ;;  %v157_v39 = vsel %vm156_vm15, 1, %v1121_v2 }
  0xf3   :  { %v556_v41 = vsel %vm555_vm2, 1, %v1121_v2  ;;  %v161_v42 = vrot.slane %v157_v39, %v1232_v15  ;;  %vm137_vm0 = vmand %vm135_vm3, %vm136_vm12 }
  0xf4   :  { %v560_v43 = vrot.slane %v556_v41, %v1232_v15  ;;  %v138_v47 = vsel %vm137_vm0, 1, %v1121_v2  ;;  %vm886_vm15 = vmpackc.low %vm1297_vm1, %vm1297_vm1 }
  0xf5   :  { %vm1306_vm14 = vcmp.eq.s32.totalorder %v161_v42, 1  ;;  %v142_v55 = vrot.slane %v138_v47, %v1232_v15  ;;  %vm624_vm5 = vmand %vm623_vm8, %vm155_vm7  ;;  %vm1462_vm8 = vcmask 130048  }
  0xf6   :  { %761 = vperm.xlu0 %1063, %v757_v30   ;;  %1090 = vrot.lane.b32.xlu1 %v1074_v27, %s1128_s30  ;;  %vm1313_vm2 = vcmp.eq.s32.totalorder %v560_v43, 1  ;;  %vm853_vm3 = vmpackc.low %vm1306_vm14, %vm1306_vm14  ;;  %v625_v60 = vsel %vm624_vm5, 1, %v1121_v2  ;;  %v1114_v30 = vld [vmem:[%s1437_s6 + $0x38] sm:$0xff]  }
  0xf7   :  { %vm893_vm0 = vmpackc.low %vm1313_vm2, %vm1313_vm2  ;;  %vm1335_vm1 = vcmp.eq.s32.totalorder %v142_v55, 1  ;;  %v629_v6 = vrot.slane %v625_v60, %v1232_v15  ;;  %vm1463_vm2 = vmmov 0  }
  0xf8   :  { %vm274_vm7 = vmand %vm1261_vm9, %vm273_vm13 }
  0xf9   :  { %vm276_vm9 = vmand %vm274_vm7, %vm275_vm4  ;;  %vm1360_vm5 = vcmp.eq.s32.totalorder %v629_v6, 1 }
  0xfa   :  { %1100 = vrot.lane.b32.xlu1 %v1074_v27, %s1129_s10  ;;  %vm1464_vm14 = vmmov %vm1462_vm8  ;;  %v277_v9 = vsel %vm276_vm9, 1, %v1121_v2 }
  0xfb   :  { %v281_v14 = vrot.slane %v277_v9, %v1232_v15 }
  0xfe   :  { %766 = vperm.xlu1 %1104, %v758_v31  }
 0x15c   :  { %v1076_v45 = vpop.permute.xlu0 %1075  ;;  %v1066_v46 = vpop.permute.xlu1 %1065 }
 0x15d   :  { %v1068_v48 = vunpack.i.h.bf16 %v1066_v46  ;;  %v1067_v49 = vunpack.i.l.bf16 %v1066_v46  ;;  %v1078_v52 = vunpack.i.h.bf16 %v1076_v45  ;;  %v1077_v53 = vunpack.i.l.bf16 %v1076_v45 }
 0x15f   :  { %v887_v54 = vpack.c.bf16 %v1068_v48, %v1067_v49  ;;  %v894_v61 = vpack.c.bf16 %v1078_v52, %v1077_v53 }
 0x160   :  { %v1071_v56 = vpop.permute.xlu1 %1070  ;;  %v1086_v8 = vpop.permute.xlu0 %1085 }
 0x161   :  { %v1073_v58 = vunpack.i.h.bf16 %v1071_v56  ;;  %v1072_v59 = vunpack.i.l.bf16 %v1071_v56  ;;  %987 = vmatpush3.bf16.msk.msra.mxu1 %vm886_vm15, %v887_v54  ;;  %vm858_vm15 = vmpackc.low %vm1335_vm1, %vm1335_vm1  ;;  %v1088_v11 = vunpack.i.h.bf16 %v1086_v8  ;;  %v1087_v13 = vunpack.i.l.bf16 %v1086_v8 }
 0x162   :  { %992 = vmatprep.subr.bf16.mxu1 %v1119_v0  ;;  %vm1467_vm1 = vmmov %vm1462_vm8 }
 0x163   :  { %v854_v62 = vpack.c.bf16 %v1073_v58, %v1072_v59  ;;  %v901_v18 = vpack.c.bf16 %v1088_v11, %v1087_v13 }
 0x164   :  { %v1081_v1 = vpop.permute.xlu1 %1080  ;;  %989 = vmatmul.mubr.msk.bf16.vlgmr.msra.gmra.mrb[0].mxu1 %vm1462_vm8, %v1110_v57  ;;  %v1096_v24 = vpop.permute.xlu0 %1095 }
 0x165   :  { %v1083_v4 = vunpack.i.h.bf16 %v1081_v1  ;;  %v1082_v5 = vunpack.i.l.bf16 %v1081_v1  ;;  %957 = vmatpush3.bf16.msk.msra.mxu0 %vm853_vm3, %v854_v62  ;;  %993 = vmatpush3.bf16.msk.msra.mxu1 %vm893_vm0, %v894_v61  ;;  %vm692_vm3 = vmand %vm1266_vm11, %vm273_vm13  ;;  %vm282_vm11 = vcmp.eq.s32.totalorder %v281_v14, 1  ;;  %v1098_v26 = vunpack.i.h.bf16 %v1096_v24 }
 0x166   :  { %962 = vmatprep.subr.bf16.mxu0 %v1119_v0  ;;  %994 = vmatprep.mubr.msk.bf16.mxu1 %vm1463_vm2, %v1119_v0  ;;  %vm900_vm0 = vmpackc.low %vm1360_vm5, %vm1360_vm5  ;;  %v1097_v27 = vunpack.i.l.bf16 %v1096_v24 }
 0x167   :  { %v859_v7 = vpack.c.bf16 %v1083_v4, %v1082_v5  ;;  %998 = vmatprep.subr.bf16.mxu1 %v1119_v0  ;;  %vm693_vm7 = vmand %vm692_vm3, %vm275_vm4  ;;  %vm1471_vm3 = vcmask 1041408  }
 0x168   :  { %959 = vmatmul.mubr.msk.bf16.vlgmr.msra.gmra.mrb[4].mxu0 %vm1464_vm14, %v1111_v3  ;;  %v1091_v16 = vpop.permute.xlu1 %1090  ;;  %vm347_vm13 = vmand %vm1221_vm6, %vm134_vm10  ;;  %v694_v22 = vsel %vm693_vm7, 1, %v1121_v2  ;;  %v908_v31 = vpack.c.bf16 %v1098_v26, %v1097_v27  ;;  %v784_v36 = vsel %vm1471_vm3, %v773_v34, 0 }
 0x169   :  { %963 = vmatpush3.bf16.msk.msra.mxu0 %vm858_vm15, %v859_v7  ;;  %964 = vmatprep.mubr.msk.bf16.mxu0 %vm1463_vm2, %v1119_v0  ;;  %v1093_v19 = vunpack.i.h.bf16 %v1091_v16  ;;  %v1092_v20 = vunpack.i.l.bf16 %v1091_v16  ;;  %vm348_vm4 = vmand %vm347_vm13, %vm136_vm12  ;;  %v698_v23 = vrot.slane %v694_v22, %v1232_v15  ;;  %vm779_vm13 = vcmask 31744  }
 0x16a   :  { %968 = vmatprep.subr.bf16.mxu0 %v1119_v0  ;;  %vm865_vm6 = vmpackc.low %vm282_vm11, %vm282_vm11  ;;  %v349_v25 = vsel %vm348_vm4, 1, %v1121_v2 }
 0x16b   :  { %v866_v12 = vpack.c.bf16 %v1093_v19, %v1092_v20  ;;  %vm1468_vm10 = vmmov %vm1467_vm1  ;;  %vm699_vm12 = vcmp.eq.s32.totalorder %v698_v23, 1  ;;  %v353_v28 = vrot.slane %v349_v25, %v1232_v15 }
 0x16c   :  { %v1101_v29 = vpop.permute.xlu1 %1100  ;;  %vm907_vm8 = vmpackc.low %vm699_vm12, %vm699_vm12 }
 0x16d   :  { %v1103_v32 = vunpack.i.h.bf16 %v1101_v29  ;;  %v1102_v2 = vunpack.i.l.bf16 %v1101_v29  ;;  %vm354_vm9 = vcmp.eq.s32.totalorder %v353_v28, 1  ;;  %vm1469_vm15 = vmmov %vm1467_vm1 }
 0x16e   :  { %vm872_vm14 = vmpackc.low %vm354_vm9, %vm354_vm9 }
 0x16f   :  { %v873_v15 = vpack.c.bf16 %v1103_v32, %v1102_v2  ;;  %vm1470_vm5 = vmmov %vm1467_vm1 }
 0x170   :  { %995 = vmatmul.mubr.msk.bf16.vlgmr.msra.gmra.mrb[0].mxu1 %vm1467_vm1, %v1112_v17 }
 0x171   :  { %999 = vmatpush3.bf16.msk.msra.mxu1 %vm900_vm0, %v901_v18  ;;  %1000 = vmatprep.mubr.msk.bf16.mxu1 %vm1463_vm2, %v1119_v0  ;;  %vm1472_vm0 = vmmov %vm1467_vm1 }
 0x172   :  { %1004 = vmatprep.subr.bf16.mxu1 %v1119_v0  ;;  %vm1473_vm7 = vmmov %vm1472_vm0 }
 0x174   :  { %965 = vmatmul.mubr.msk.bf16.vlgmr.msra.gmra.mrb[4].mxu0 %vm1468_vm10, %v1113_v21 }
 0x175   :  { %969 = vmatpush3.bf16.msk.msra.mxu0 %vm865_vm6, %v866_v12  ;;  %970 = vmatprep.mubr.msk.bf16.mxu0 %vm1463_vm2, %v1119_v0  ;;  %v762_v43 = vpop.permute.xlu0 %761 }
 0x176   :  { %974 = vmatprep.subr.bf16.mxu0 %v1119_v0 }
 0x17c   :  { %1001 = vmatmul.mubr.msk.bf16.vlgmr.msra.gmra.mrb[0].mxu1 %vm1469_vm15, %v1114_v30 }
 0x17d   :  { %1005 = vmatpush3.bf16.msk.msra.mxu1 %vm907_vm8, %v908_v31  ;;  %1006 = vmatprep.mubr.msk.bf16.mxu1 %vm1463_vm2, %v1119_v0  ;;  %v767_v44 = vpop.permute.xlu1 %766 }
 0x17e   :  { %1010 = vmatprep.subr.bf16.mxu1 %v1119_v0 }
 0x180   :  { %971 = vmatmul.mubr.msk.bf16.vlgmr.msra.gmra.mrb[4].mxu0 %vm1470_vm5, %v1115_v33 }
 0x181   :  { %975 = vmatpush3.bf16.msk.msra.mxu0 %vm872_vm14, %v873_v15  ;;  %976 = vmatprep.mubr.msk.bf16.mxu0 %vm1463_vm2, %v1119_v0 }
 0x188   :  { %1007 = vmatmul.mubr.msk.bf16.vlgmr.msra.gmra.mrb[0].mxu1 %vm1472_vm0, %v1116_v35 }
 0x189   :  { %1011 = vmatpush3.bf16.msra.mxu1 %v784_v36  ;;  %1012 = vmatprep.mubr.msk.bf16.mxu1 %vm1463_vm2, %v1119_v0 }
 0x18c   :  { %977 = vmatmul.mubr.msk.bf16.vlgmr.msra.gmra.mrb[4].mxu0 %vm1473_vm7, %v1117_v37 }
 0x194   :  { %1013 = vmatmul.mubr.msk.bf16.vlgmr.msra.gmra.mrb[0].mxu1 %vm779_vm13, %v1118_v38 }
 0x25f   :  { %v403_v39 = vpop.f32.mrb[4].mxu0 }
 0x260   :  { %v978_v40 = vpop.f32.mrb[5].mxu0  ;;  %v1016_v45 = vadd.f32 %v762_v43, %v403_v39 }
 0x261   :  { %v406_v41 = vpop.f32.mrb[6].mxu0 }
 0x262   :  { %v979_v42 = vpop.f32.mrb[7].mxu0  ;;  %v1018_v47 = vadd.f32 %v767_v44, %v406_v41 }
 0x267   :  { %v820_v46 = vpop.f32.mrb[0].mxu1 }
 0x268   :  { %v1017_v48 = vadd.f32 %v1016_v45, %v820_v46  ;;  %v1014_v49 = vpop.f32.mrb[1].mxu1 }
 0x269   :  { %v823_v0 = vpop.f32.mrb[2].mxu1 }
 0x26a   :  { %v1019_v50 = vadd.f32 %v1018_v47, %v823_v0  ;;  %v1015_v51 = vpop.f32.mrb[3].mxu1  ;;  %v829_v52 = vmax.f32 %v1017_v48, 0.0 }
 0x26c   :  { %v830_v53 = vmax.f32 %v1019_v50, 0.0 }
 0x26e   :  { %v920_v54 = vpack.c.bf16 %v830_v53, %v829_v52 }
 0x270   :  { %921 = vst [vmem:[%s1443_s9] sm:$0xff] %v920_v54  }

// kernel: _lambda_.3
= control target key start
LH: loop header
LB: loop body
LE: loop exit
PB: predicated region body
PF: predicated region fallthrough
CT: control target
= control target key end

     0   :  { %v1625_v1 = vmov 0.0   ;;  %vm1626_vm0 = vmmov 0   ;;  %v1627_v4 = vmov 0   ;;  %s1629_s26 = smov 7   ;;  %s1630_s27 = smov 9   ;;  %v47_v14 = vlaneseq  ;;  %s2120_s2 = inlined_call_operand.vmem [shape: bf16[16,128], index: 2, kind: input, shape index: {}]   ;;  %s2121_s3 = inlined_call_operand.vmem [shape: bf16[9,16,16], index: 3, kind: input, shape index: {}]   ;;  %s2122_s4 = inlined_call_operand.vmem [shape: f32[16,1], index: 4, kind: input, shape index: {}]   ;;  %s2123_s0 = inlined_call_operand.vmem [shape: s32[1,128], index: 0, kind: input, shape index: {}]   ;;  %s2124_s1 = inlined_call_operand.vmem [shape: s32[1,128], index: 1, kind: input, shape index: {}]   ;;  %s2125_s5 = inlined_call_operand.vmem [shape: bf16[9,16,16], index: 5, kind: input, shape index: {}]   ;;  %s2126_s6 = inlined_call_operand.vmem [shape: f32[16,1], index: 6, kind: input, shape index: {}]   ;;  %s2127_s7 = inlined_call_operand.vmem [shape: f32[16,128], index: 7, kind: output, shape index: {}]  }
   0x1   :  { %v1679_v0 = vld [vmem:[%s2120_s2] sm:$0xff]   ;;  %1404 = vmatprep.subr.bf16.mxu0 %v1625_v1  ;;  %1406 = vmatprep.mubr.msk.bf16.mxu0 %vm1626_vm0, %v1625_v1  ;;  %s1628_s2 = smov 8   ;;  %s1631_s28 = smov 1   ;;  %v666_v7 = vld [vmem:[%s2122_s4 + $0x8] sm:$0xff]  ;;  %v1607_v57 = vld [vmem:[%s2121_s3 + $0x10] sm:$0xff]  }
   0x2   :  { %v31_v2 = vunpack.c.l.bf16 %v1679_v0  ;;  %v32_v3 = vunpack.c.h.bf16 %v1679_v0  ;;  %1410 = vmatprep.subr.bf16.mxu1 %v1625_v1  ;;  %1412 = vmatprep.mubr.msk.bf16.mxu1 %vm1626_vm0, %v1625_v1  ;;  %s1632_s29 = smov 127   ;;  %s1633_s30 = smov 121   ;;  %v665_v6 = vld [vmem:[%s2122_s4] sm:$0xff]  ;;  %v48_v15 = vshrl.u32 %v47_v14, 7  ;;  %v1605_v42 = vld [vmem:[%s2121_s3 + $0x8] sm:$0xff]   ;;  %v1617_v30 = vld [vmem:[%s2125_s5 + $0x10] sm:$0xff]  }
   0x3   :  { %1563 = vset.pattern.permute.xlu0 %v1627_v4  ;;  %1564 = vset.pattern.permute.xlu1 %v1627_v4  ;;  %s1634_s8 = smov 120   ;;  %s1635_s9 = smov 119   ;;  %v27_v8 = vld [vmem:[%s2123_s0] sm:$0x1]  ;;  %v1618_v44 = vld [vmem:[%s2125_s5 + $0x18] sm:$0xff]   ;;  %v1620_v62 = vld [vmem:[%s2125_s5 + $0x28] sm:$0xff]  }
   0x4   :  { %v1523_v5 = vpack.i.bf16 %v32_v3, %v31_v2  ;;  %v37_v9 = vadd.s32 4294967295, %v27_v8  ;;  %v1715_v10 = vld [vmem:[%s2124_s1] sm:$0x1]  ;;  %vm252_vm10 = vcmp.ge.s32.totalorder %v27_v8, 0  ;;  %vm253_vm11 = vcmp.lt.s32.totalorder %v27_v8, 8  ;;  %v1621_v11 = vld [vmem:[%s2125_s5 + $0x30] sm:$0xff]  }
   0x5   :  { %vm2129_vm4 = vcmp.ge.s32.totalorder %v1715_v10, 0  ;;  %v1723_v12 = vadd.s32 4294967295, %v1715_v10  ;;  %v1726_v13 = vadd.s32 1, %v1715_v10  ;;  %vm2128_vm6 = vcmp.lt.s32.totalorder %v1715_v10, 8  ;;  %v1606_v51 = vld [vmem:[%s2121_s3] sm:$0xff]  }
   0x6   :  { %1524 = vrot.lane.b32.xlu0 %v1523_v5, %s1628_s2  ;;  %1534 = vrot.lane.b32.xlu1 %v1523_v5, %s1629_s26  ;;  %vm38_vm1 = vcmp.ge.s32.totalorder %v37_v9, 0  ;;  %vm39_vm2 = vcmp.lt.s32.totalorder %v37_v9, 8  ;;  %v1753_v17 = vsub.s32 0, %v48_v15  ;;  %v458_v23 = vadd.s32 1, %v27_v8  ;;  %v1619_v54 = vld [vmem:[%s2125_s5 + $0x20] sm:$0xff]  }
   0x7   :  { %vm1717_vm3 = vmand %vm38_vm1, %vm39_vm2  ;;  %vm42_vm7 = vcmp.ge.s32.totalorder %v1723_v12, 0  ;;  %vm2130_vm8 = vcmp.ge.s32.totalorder %v1726_v13, 0  ;;  %vm44_vm13 = vcmp.lt.s32.totalorder %v1723_v12, 8  ;;  %vm2134_vm15 = vcmp.lt.s32.totalorder %v1726_v13, 8 }
   0x8   :  { %vm62_vm5 = vmand %vm1717_vm3, %vm2129_vm4 }
   0x9   :  { %vm64_vm9 = vmand %vm62_vm5, %vm2128_vm6 }
   0xa   :  { %1529 = vrot.lane.b32.xlu0 %v1523_v5, %s1630_s27  ;;  %1539 = vrot.lane.b32.xlu1 %v1523_v5, %s1631_s28  ;;  %vm43_vm12 = vmand %vm1717_vm3, %vm42_vm7  ;;  %v65_v18 = vsel %vm64_vm9, 1, %v1627_v4 }
   0xb   :  { %vm182_vm14 = vmand %vm1717_vm3, %vm2130_vm8  ;;  %v69_v20 = vrot.slane %v65_v18, %v1753_v17 }
   0xc   :  { %vm1747_vm1 = vmand %vm252_vm10, %vm253_vm11 }
   0xd   :  { %vm45_vm2 = vmand %vm43_vm12, %vm44_vm13  ;;  %vm1773_vm11 = vcmp.eq.s32.totalorder %v69_v20, 1 }
   0xe   :  { %1544 = vrot.lane.b32.xlu0 %v1523_v5, %s1632_s29  ;;  %1549 = vrot.lane.b32.xlu1 %v1523_v5, %s1633_s30  ;;  %vm184_vm5 = vmand %vm182_vm14, %vm2134_vm15  ;;  %v46_v19 = vsel %vm45_vm2, 1, %v1627_v4  ;;  %vm459_vm2 = vcmp.ge.s32.totalorder %v458_v23, 0 }
   0xf   :  { %vm255_vm3 = vmand %vm1747_vm1, %vm42_vm7  ;;  %v185_v21 = vsel %vm184_vm5, 1, %v1627_v4  ;;  %v50_v22 = vrot.slane %v46_v19, %v1753_v17 }
  0x10   :  { %vm256_vm10 = vmand %vm255_vm3, %vm44_vm13  ;;  %v189_v24 = vrot.slane %v185_v21, %v1753_v17  ;;  %v1611_v21 = vld [vmem:[%s2121_s3 + $0x28] sm:$0xff]  }
  0x11   :  { %vm320_vm9 = vmand %vm1747_vm1, %vm2129_vm4  ;;  %v257_v26 = vsel %vm256_vm10, 1, %v1627_v4  ;;  %vm1780_vm14 = vcmp.eq.s32.totalorder %v50_v22, 1  ;;  %vm460_vm10 = vcmp.lt.s32.totalorder %v458_v23, 8  ;;  %vm82_vm4 = vcmask 130048  }
  0x12   :  { %1554 = vrot.lane.b32.xlu0 %v1523_v5, %s1634_s8  ;;  %1559 = vrot.lane.b32.xlu1 %v1523_v5, %s1635_s9  ;;  %vm321_vm12 = vmand %vm320_vm9, %vm2128_vm6  ;;  %vm1787_vm3 = vcmp.eq.s32.totalorder %v189_v24, 1  ;;  %v261_v31 = vrot.slane %v257_v26, %v1753_v17  ;;  %v1608_v5 = vld [vmem:[%s2121_s3 + $0x18] sm:$0xff]   ;;  %v1612_v26 = vld [vmem:[%s2121_s3 + $0x30] sm:$0xff]  }
  0x13   :  { %vm2131_vm5 = vmpackc.low %vm1773_vm11, %vm1773_vm11  ;;  %v322_v32 = vsel %vm321_vm12, 1, %v1627_v4 }
  0x14   :  { %vm2132_vm9 = vmpackc.low %vm1780_vm14, %vm1780_vm14  ;;  %v326_v45 = vrot.slane %v322_v32, %v1753_v17 }
  0x15   :  { %vm1800_vm6 = vmand %vm1747_vm1, %vm2130_vm8  ;;  %vm1815_vm8 = vcmp.eq.s32.totalorder %v261_v31, 1  ;;  %v1614_v31 = vld [vmem:[%s2121_s3 + $0x40] sm:$0xff]  }
  0x16   :  { %669 = vperm.xlu0 %1563, %v665_v6   ;;  %674 = vperm.xlu1 %1564, %v666_v7   ;;  %vm1805_vm12 = vmand %vm459_vm2, %vm460_vm10 }
  0x17   :  { %vm2133_vm1 = vmpackc.low %vm1787_vm3, %vm1787_vm3 }
  0x18   :  { %vm390_vm2 = vmand %vm1800_vm6, %vm2134_vm15  ;;  %vm1852_vm6 = vcmp.eq.s32.totalorder %v326_v45, 1 }
  0x19   :  { %vm462_vm10 = vmand %vm1805_vm12, %vm42_vm7  ;;  %v391_v52 = vsel %vm390_vm2, 1, %v1627_v4  ;;  %vm2156_vm2 = vcmp.ge.s32.totalorder %v1715_v10, 0 }
  0x1a   :  { %vm463_vm7 = vmand %vm462_vm10, %vm44_vm13  ;;  %v395_v56 = vrot.slane %v391_v52, %v1753_v17  ;;  %vm2157_vm10 = vcmp.lt.s32.totalorder %v1715_v10, 8 }
  0x1b   :  { %vm1274_vm13 = vmpackc.low %vm1852_vm6, %vm1852_vm6  ;;  %v464_v58 = vsel %vm463_vm7, 1, %v1627_v4 }
  0x1c   :  { %vm1889_vm15 = vcmp.eq.s32.totalorder %v395_v56, 1  ;;  %v468_v63 = vrot.slane %v464_v58, %v1753_v17 }
  0x78   :  { %v1525_v28 = vpop.permute.xlu0 %1524  ;;  %v1535_v29 = vpop.permute.xlu1 %1534 }
  0x79   :  { %v1527_v33 = vunpack.i.h.bf16 %v1525_v28  ;;  %v1526_v34 = vunpack.i.l.bf16 %v1525_v28  ;;  %v1537_v35 = vunpack.i.h.bf16 %v1535_v29  ;;  %v1536_v36 = vunpack.i.l.bf16 %v1535_v29  ;;  %v1613_v29 = vld [vmem:[%s2121_s3 + $0x38] sm:$0xff]  }
  0x7b   :  { %v1249_v38 = vpack.c.bf16 %v1527_v33, %v1526_v34  ;;  %v1261_v41 = vpack.c.bf16 %v1537_v35, %v1536_v36 }
  0x7c   :  { %v1530_v40 = vpop.permute.xlu0 %1529  ;;  %v1540_v43 = vpop.permute.xlu1 %1539 }
  0x7d   :  { %v1532_v46 = vunpack.i.h.bf16 %v1530_v40  ;;  %v1531_v47 = vunpack.i.l.bf16 %v1530_v40  ;;  %1405 = vmatpush3.bf16.msk.msra.mxu0 %vm2131_vm5, %v1249_v38  ;;  %v1542_v48 = vunpack.i.h.bf16 %v1540_v43  ;;  %v1541_v49 = vunpack.i.l.bf16 %v1540_v43  ;;  %vm1267_vm5 = vmpackc.low %vm1815_vm8, %vm1815_vm8 }
  0x7e   :  { %1416 = vmatprep.subr.bf16.mxu0 %v1625_v1 }
  0x7f   :  { %v1254_v50 = vpack.c.bf16 %v1532_v46, %v1531_v47  ;;  %v1268_v53 = vpack.c.bf16 %v1542_v48, %v1541_v49 }
  0x80   :  { %1407 = vmatmul.mubr.msk.bf16.vlgmr.msra.gmra.mrb[0].mxu0 %vm82_vm4, %v1605_v42  ;;  %v1545_v55 = vpop.permute.xlu0 %1544  ;;  %v1550_v61 = vpop.permute.xlu1 %1549 }
  0x81   :  { %1411 = vmatpush3.bf16.msk.msra.mxu1 %vm2132_vm9, %v1254_v50  ;;  %1417 = vmatpush3.bf16.msk.msra.mxu0 %vm2133_vm1, %v1261_v41  ;;  %vm531_vm9 = vmand %vm1805_vm12, %vm2156_vm2  ;;  %v1547_v59 = vunpack.i.h.bf16 %v1545_v55  ;;  %v1546_v60 = vunpack.i.l.bf16 %v1545_v55  ;;  %vm2158_vm1 = vcmp.ge.s32.totalorder %v1726_v13, 0  ;;  %v1552_v8 = vunpack.i.h.bf16 %v1550_v61 }
  0x82   :  { %1418 = vmatprep.mubr.msk.bf16.mxu0 %vm1626_vm0, %v1625_v1  ;;  %1422 = vmatprep.subr.bf16.mxu1 %v1625_v1  ;;  %vm532_vm2 = vmand %vm531_vm9, %vm2157_vm10  ;;  %v1551_v9 = vunpack.i.l.bf16 %v1550_v61  ;;  %vm2161_vm9 = vcmp.lt.s32.totalorder %v1726_v13, 8  ;;  %vm1913_vm10 = vcmp.eq.s32.totalorder %v468_v63, 1  ;;  %v1610_v13 = vld [vmem:[%s2121_s3 + $0x20] sm:$0xff]  }
  0x83   :  { %1428 = vmatprep.subr.bf16.mxu0 %v1625_v1  ;;  %vm600_vm7 = vmand %vm1805_vm12, %vm2158_vm1  ;;  %v533_v6 = vsel %vm532_vm2, 1, %v1627_v4  ;;  %v1282_v7 = vpack.c.bf16 %v1547_v59, %v1546_v60 }
  0x84   :  { %1413 = vmatmul.mubr.msk.bf16.vlgmr.msra.gmra.mrb[0].mxu1 %vm82_vm4, %v1606_v51  ;;  %vm601_vm12 = vmand %vm600_vm7, %vm2161_vm9  ;;  %v1555_v10 = vpop.permute.xlu0 %1554  ;;  %v537_v12 = vrot.slane %v533_v6, %v1753_v17  ;;  %v1289_v15 = vpack.c.bf16 %v1552_v8, %v1551_v9  ;;  %v1560_v19 = vpop.permute.xlu1 %1559 }
  0x85   :  { %1423 = vmatpush3.bf16.msk.msra.mxu1 %vm1267_vm5, %v1268_v53  ;;  %1424 = vmatprep.mubr.msk.bf16.mxu1 %vm1626_vm0, %v1625_v1  ;;  %vm1281_vm1 = vmpackc.low %vm1889_vm15, %vm1889_vm15  ;;  %v602_v14 = vsel %vm601_vm12, 1, %v1627_v4  ;;  %v1557_v16 = vunpack.i.h.bf16 %v1555_v10  ;;  %v1556_v18 = vunpack.i.l.bf16 %v1555_v10  ;;  %v1562_v23 = vunpack.i.h.bf16 %v1560_v19  ;;  %v1622_v4 = vld [vmem:[%s2125_s5 + $0x38] sm:$0xff]  }
  0x86   :  { %1434 = vmatprep.subr.bf16.mxu1 %v1625_v1  ;;  %vm2135_vm2 = vmpackc.low %vm1913_vm10, %vm1913_vm10  ;;  %vm1934_vm7 = vcmp.eq.s32.totalorder %v537_v12, 1  ;;  %v606_v20 = vrot.slane %v602_v14, %v1753_v17  ;;  %v1561_v24 = vunpack.i.l.bf16 %v1560_v19 }
  0x87   :  { %v1296_v22 = vpack.c.bf16 %v1557_v16, %v1556_v18  ;;  %vm2137_vm9 = vmpackc.low %vm1934_vm7, %vm1934_vm7 }
  0x88   :  { %1419 = vmatmul.mubr.msk.bf16.vlgmr.msra.gmra.mrb[4].mxu0 %vm82_vm4, %v1607_v57  ;;  %vm1954_vm12 = vcmp.eq.s32.totalorder %v606_v20, 1  ;;  %v1303_v28 = vpack.c.bf16 %v1562_v23, %v1561_v24  ;;  %vm2171_vm8 = vmpackc.low %vm1913_vm10, %vm1913_vm10 }
  0x89   :  { %1429 = vmatpush3.bf16.msk.msra.mxu0 %vm1274_vm13, %v1679_v0  ;;  %1430 = vmatprep.mubr.msk.bf16.mxu0 %vm1626_vm0, %v1625_v1  ;;  %vm2172_vm15 = vmpackc.low %vm1934_vm7, %vm1934_vm7 }
  0x8a   :  { %1440 = vmatprep.subr.bf16.mxu0 %v1625_v1 }
  0x8c   :  { %1425 = vmatmul.mubr.msk.bf16.vlgmr.msra.gmra.mrb[4].mxu1 %vm82_vm4, %v1608_v5 }
  0x8d   :  { %1435 = vmatpush3.bf16.msk.msra.mxu1 %vm1281_vm1, %v1282_v7  ;;  %1436 = vmatprep.mubr.msk.bf16.mxu1 %vm1626_vm0, %v1625_v1 }
  0x8e   :  { %1446 = vmatprep.subr.bf16.mxu1 %v1625_v1 }
  0x90   :  { %1431 = vmatmul.mubr.msk.bf16.vlgmr.msra.gmra.mrb[8].mxu0 %vm82_vm4, %v1610_v13 }
  0x91   :  { %1441 = vmatpush3.bf16.msk.msra.mxu0 %vm2135_vm2, %v1289_v15  ;;  %1442 = vmatprep.mubr.msk.bf16.mxu0 %vm1626_vm0, %v1625_v1  ;;  %vm2136_vm2 = vmpackc.low %vm1954_vm12, %vm1954_vm12 }
  0x92   :  { %1452 = vmatprep.subr.bf16.mxu0 %v1625_v1 }
  0x94   :  { %1437 = vmatmul.mubr.msk.bf16.vlgmr.msra.gmra.mrb[8].mxu1 %vm82_vm4, %v1611_v21 }
  0x95   :  { %1447 = vmatpush3.bf16.msk.msra.mxu1 %vm2137_vm9, %v1296_v22  ;;  %1448 = vmatprep.mubr.msk.bf16.mxu1 %vm1626_vm0, %v1625_v1  ;;  %vm2169_vm9 = vmpackc.low %vm1780_vm14, %vm1780_vm14 }
  0x96   :  { %1458 = vmatprep.subr.bf16.mxu1 %v1625_v1  ;;  %vm2173_vm14 = vmpackc.low %vm1954_vm12, %vm1954_vm12 }
  0x98   :  { %1443 = vmatmul.mubr.msk.bf16.vlgmr.msra.gmra.mrb[12].mxu0 %vm82_vm4, %v1612_v26  ;;  %v670_v26 = vpop.permute.xlu0 %669 }
  0x99   :  { %1453 = vmatpush3.bf16.msk.msra.mxu0 %vm2136_vm2, %v1303_v28  ;;  %1454 = vmatprep.mubr.msk.bf16.mxu0 %vm1626_vm0, %v1625_v1  ;;  %vm2168_vm2 = vmpackc.low %vm1773_vm11, %vm1773_vm11 }
  0x9a   :  { %1464 = vmatprep.subr.bf16.mxu0 %v1625_v1  ;;  %vm2170_vm11 = vmpackc.low %vm1787_vm3, %vm1787_vm3 }
  0x9c   :  { %1449 = vmatmul.mubr.msk.bf16.vlgmr.msra.gmra.mrb[12].mxu1 %vm82_vm4, %v1613_v29 }
  0x9d   :  { %1460 = vmatprep.mubr.msk.bf16.mxu1 %vm1626_vm0, %v1625_v1 }
  0xa0   :  { %1455 = vmatmul.mubr.msk.bf16.vlgmr.msra.gmra.mrb[16].mxu0 %vm82_vm4, %v1614_v31 }
  0xa1   :  { %1466 = vmatprep.mubr.msk.bf16.mxu0 %vm1626_vm0, %v1625_v1 }
 0x153   :  { %v120_v32 = vpop.f32.mrb[0].mxu0 }
 0x154   :  { %v1408_v33 = vpop.f32.mrb[1].mxu0 }
 0x155   :  { %v123_v34 = vpop.f32.mrb[2].mxu0 }
 0x156   :  { %v1409_v35 = vpop.f32.mrb[3].mxu0 }
 0x157   :  { %v169_v36 = vpop.f32.mrb[0].mxu1 }
 0x158   :  { %v170_v37 = vadd.f32 %v169_v36, %v120_v32  ;;  %v1414_v38 = vpop.f32.mrb[1].mxu1  ;;  %v675_v32 = vpop.permute.xlu1 %674 }
 0x159   :  { %v172_v39 = vpop.f32.mrb[2].mxu1 }
 0x15a   :  { %v173_v40 = vadd.f32 %v172_v39, %v123_v34  ;;  %v1415_v41 = vpop.f32.mrb[3].mxu1 }
 0x15b   :  { %v239_v42 = vpop.f32.mrb[4].mxu0  ;;  %v1222_v41 = vld [vmem:[%s2126_s6 + $0x8] sm:$0xff] }
 0x15c   :  { %v246_v43 = vadd.f32 %v239_v42, %v170_v37  ;;  %v1420_v45 = vpop.f32.mrb[5].mxu0  ;;  %v1221_v42 = vld [vmem:[%s2126_s6] sm:$0xff] }
 0x15d   :  { %v242_v46 = vpop.f32.mrb[6].mxu0 }
 0x15e   :  { %v247_v47 = vadd.f32 %v242_v46, %v173_v40  ;;  %v1421_v48 = vpop.f32.mrb[7].mxu0 }
 0x15f   :  { %v311_v49 = vpop.f32.mrb[4].mxu1 }
 0x160   :  { %v318_v50 = vadd.f32 %v311_v49, %v246_v43  ;;  %v1426_v51 = vpop.f32.mrb[5].mxu1 }
 0x161   :  { %v314_v52 = vpop.f32.mrb[6].mxu1 }
 0x162   :  { %v319_v53 = vadd.f32 %v314_v52, %v247_v47  ;;  %v1427_v55 = vpop.f32.mrb[7].mxu1 }
 0x163   :  { %v376_v56 = vpop.f32.mrb[8].mxu0  ;;  %v1615_v55 = vld [vmem:[%s2125_s5] sm:$0xff]  }
 0x164   :  { %v383_v57 = vadd.f32 %v376_v56, %v318_v50  ;;  %v1432_v58 = vpop.f32.mrb[9].mxu0  ;;  %v1616_v56 = vld [vmem:[%s2125_s5 + $0x8] sm:$0xff]  }
 0x165   :  { %v379_v59 = vpop.f32.mrb[10].mxu0 }
 0x166   :  { %v384_v60 = vadd.f32 %v379_v59, %v319_v53  ;;  %v1433_v61 = vpop.f32.mrb[11].mxu0 }
 0x167   :  { %v445_v63 = vpop.f32.mrb[8].mxu1 }
 0x168   :  { %v452_v5 = vadd.f32 %v445_v63, %v383_v57  ;;  %v1438_v6 = vpop.f32.mrb[9].mxu1 }
 0x169   :  { %v448_v7 = vpop.f32.mrb[10].mxu1 }
 0x16a   :  { %v453_v8 = vadd.f32 %v448_v7, %v384_v60  ;;  %v1439_v9 = vpop.f32.mrb[11].mxu1 }
 0x16b   :  { %v518_v10 = vpop.f32.mrb[12].mxu0 }
 0x16c   :  { %v525_v12 = vadd.f32 %v518_v10, %v452_v5  ;;  %v1444_v13 = vpop.f32.mrb[13].mxu0 }
 0x16d   :  { %v521_v14 = vpop.f32.mrb[14].mxu0 }
 0x16e   :  { %v526_v15 = vadd.f32 %v521_v14, %v453_v8  ;;  %v1445_v16 = vpop.f32.mrb[15].mxu0 }
 0x16f   :  { %v587_v18 = vpop.f32.mrb[12].mxu1 }
 0x170   :  { %v594_v19 = vadd.f32 %v587_v18, %v525_v12  ;;  %v1450_v20 = vpop.f32.mrb[13].mxu1 }
 0x171   :  { %v590_v21 = vpop.f32.mrb[14].mxu1 }
 0x172   :  { %v595_v22 = vadd.f32 %v590_v21, %v526_v15  ;;  %v1451_v23 = vpop.f32.mrb[15].mxu1  ;;  %v1623_v21 = vld [vmem:[%s2125_s5 + $0x40] sm:$0xff]  }
 0x173   :  { %v656_v24 = vpop.f32.mrb[16].mxu0 }
 0x174   :  { %v663_v28 = vadd.f32 %v656_v24, %v594_v19  ;;  %v1456_v29 = vpop.f32.mrb[17].mxu0 }
 0x175   :  { %v659_v31 = vpop.f32.mrb[18].mxu0 }
 0x176   :  { %v677_v33 = vadd.f32 %v670_v26, %v663_v28  ;;  %v664_v34 = vadd.f32 %v659_v31, %v595_v22  ;;  %v1457_v35 = vpop.f32.mrb[19].mxu0 }
 0x178   :  { %v678_v36 = vadd.f32 %v675_v32, %v664_v34  ;;  %v679_v37 = vmax.f32 %v677_v33, 0.0 }
 0x17a   :  { %v680_v38 = vmax.f32 %v678_v36, 0.0 }
 0x17c   :  { %v1570_v39 = vpack.i.bf16 %v680_v38, %v679_v37  ;;  %v1336_v40 = vpack.c.bf16 %v680_v38, %v679_v37 }
 0x17e   :  { %1571 = vrot.lane.b32.xlu0 %v1570_v39, %s1630_s27  ;;  %1566 = vrot.lane.b32.xlu1 %v1570_v39, %s1628_s2 }
 0x182   :  { %1581 = vrot.lane.b32.xlu0 %v1570_v39, %s1631_s28  ;;  %1576 = vrot.lane.b32.xlu1 %v1570_v39, %s1629_s26 }
 0x186   :  { %1591 = vrot.lane.b32.xlu0 %v1570_v39, %s1633_s30  ;;  %1586 = vrot.lane.b32.xlu1 %v1570_v39, %s1632_s29 }
 0x18a   :  { %1601 = vrot.lane.b32.xlu0 %v1570_v39, %s1635_s9  ;;  %1596 = vrot.lane.b32.xlu1 %v1570_v39, %s1634_s8 }
 0x18e   :  { %1230 = vperm.xlu0 %1563, %v1222_v41   ;;  %1225 = vperm.xlu1 %1564, %v1221_v42  }
 0x1f0   :  { %v1572_v43 = vpop.permute.xlu0 %1571  ;;  %v1567_v45 = vpop.permute.xlu1 %1566 }
 0x1f1   :  { %v1574_v46 = vunpack.i.h.bf16 %v1572_v43  ;;  %v1573_v47 = vunpack.i.l.bf16 %v1572_v43  ;;  %v1569_v48 = vunpack.i.h.bf16 %v1567_v45  ;;  %v1568_v49 = vunpack.i.l.bf16 %v1567_v45 }
 0x1f3   :  { %v1315_v50 = vpack.c.bf16 %v1574_v46, %v1573_v47  ;;  %v1310_v51 = vpack.c.bf16 %v1569_v48, %v1568_v49 }
 0x1f4   :  { %v1582_v52 = vpop.permute.xlu0 %1581  ;;  %v1577_v53 = vpop.permute.xlu1 %1576 }
 0x1f5   :  { %v1584_v57 = vunpack.i.h.bf16 %v1582_v52  ;;  %v1583_v58 = vunpack.i.l.bf16 %v1582_v52  ;;  %v1579_v59 = vunpack.i.h.bf16 %v1577_v53  ;;  %v1578_v60 = vunpack.i.l.bf16 %v1577_v53  ;;  %1459 = vmatpush3.bf16.msk.msra.mxu1 %vm2168_vm2, %v1310_v51  ;;  %1465 = vmatpush3.bf16.msk.msra.mxu0 %vm2169_vm9, %v1315_v50 }
 0x1f6   :  { %1476 = vmatprep.subr.bf16.mxu0 %v1625_v1  ;;  %1470 = vmatprep.subr.bf16.mxu1 %v1625_v1 }
 0x1f7   :  { %v1329_v61 = vpack.c.bf16 %v1584_v57, %v1583_v58  ;;  %v1322_v63 = vpack.c.bf16 %v1579_v59, %v1578_v60 }
 0x1f8   :  { %1467 = vmatmul.mubr.msk.bf16.vlgmr.msra.gmra.mrb[20].mxu0 %vm82_vm4, %v1615_v55  ;;  %v1587_v5 = vpop.permute.xlu1 %1586  ;;  %1461 = vmatmul.mubr.msk.bf16.vlgmr.msra.gmra.mrb[16].mxu1 %vm82_vm4, %v1616_v56  ;;  %v1592_v7 = vpop.permute.xlu0 %1591 }
 0x1f9   :  { %1471 = vmatpush3.bf16.msk.msra.mxu1 %vm2170_vm11, %v1322_v63  ;;  %1477 = vmatpush3.bf16.msk.msra.mxu0 %vm1267_vm5, %v1329_v61  ;;  %v1589_v25 = vunpack.i.h.bf16 %v1587_v5  ;;  %v1588_v27 = vunpack.i.l.bf16 %v1587_v5  ;;  %v1594_v9 = vunpack.i.h.bf16 %v1592_v7  ;;  %v1593_v10 = vunpack.i.l.bf16 %v1592_v7 }
 0x1fa   :  { %1472 = vmatprep.mubr.msk.bf16.mxu1 %vm1626_vm0, %v1625_v1  ;;  %1478 = vmatprep.mubr.msk.bf16.mxu0 %vm1626_vm0, %v1625_v1 }
 0x1fb   :  { %1482 = vmatprep.subr.bf16.mxu1 %v1625_v1  ;;  %1488 = vmatprep.subr.bf16.mxu0 %v1625_v1  ;;  %v1343_v6 = vpack.c.bf16 %v1589_v25, %v1588_v27  ;;  %v1350_v14 = vpack.c.bf16 %v1594_v9, %v1593_v10 }
 0x1fc   :  { %v1597_v8 = vpop.permute.xlu1 %1596  ;;  %v1602_v16 = vpop.permute.xlu0 %1601 }
 0x1fd   :  { %v1599_v12 = vunpack.i.h.bf16 %v1597_v8  ;;  %v1598_v13 = vunpack.i.l.bf16 %v1597_v8  ;;  %v1604_v18 = vunpack.i.h.bf16 %v1602_v16  ;;  %v1603_v19 = vunpack.i.l.bf16 %v1602_v16 }
 0x1ff   :  { %v1357_v15 = vpack.c.bf16 %v1599_v12, %v1598_v13  ;;  %v1364_v20 = vpack.c.bf16 %v1604_v18, %v1603_v19 }
 0x200   :  { %1473 = vmatmul.mubr.msk.bf16.vlgmr.msra.gmra.mrb[20].mxu1 %vm82_vm4, %v1617_v30  ;;  %1479 = vmatmul.mubr.msk.bf16.vlgmr.msra.gmra.mrb[24].mxu0 %vm82_vm4, %v1618_v44 }
 0x201   :  { %1483 = vmatpush3.bf16.msk.msra.mxu1 %vm1274_vm13, %v1336_v40  ;;  %1489 = vmatpush3.bf16.msk.msra.mxu0 %vm1281_vm1, %v1343_v6 }
 0x202   :  { %1484 = vmatprep.mubr.msk.bf16.mxu1 %vm1626_vm0, %v1625_v1  ;;  %1490 = vmatprep.mubr.msk.bf16.mxu0 %vm1626_vm0, %v1625_v1 }
 0x203   :  { %1494 = vmatprep.subr.bf16.mxu1 %v1625_v1  ;;  %1500 = vmatprep.subr.bf16.mxu0 %v1625_v1 }
 0x208   :  { %1485 = vmatmul.mubr.msk.bf16.vlgmr.msra.gmra.mrb[24].mxu1 %vm82_vm4, %v1619_v54  ;;  %1491 = vmatmul.mubr.msk.bf16.vlgmr.msra.gmra.mrb[28].mxu0 %vm82_vm4, %v1620_v62 }
 0x209   :  { %1495 = vmatpush3.bf16.msk.msra.mxu1 %vm2171_vm8, %v1350_v14  ;;  %1501 = vmatpush3.bf16.msk.msra.mxu0 %vm2172_vm15, %v1357_v15 }
 0x20a   :  { %1496 = vmatprep.mubr.msk.bf16.mxu1 %vm1626_vm0, %v1625_v1  ;;  %1506 = vmatprep.subr.bf16.mxu1 %v1625_v1 }
 0x20b   :  { %1502 = vmatprep.mubr.msk.bf16.mxu0 %vm1626_vm0, %v1625_v1 }
 0x20d   :  { %v1226_v13 = vpop.permute.xlu1 %1225  ;;  %v1231_v16 = vpop.permute.xlu0 %1230 }
 0x210   :  { %1497 = vmatmul.mubr.msk.bf16.vlgmr.msra.gmra.mrb[28].mxu1 %vm82_vm4, %v1621_v11  ;;  %1503 = vmatmul.mubr.msk.bf16.vlgmr.msra.gmra.mrb[32].mxu0 %vm82_vm4, %v1622_v4 }
 0x211   :  { %1507 = vmatpush3.bf16.msk.msra.mxu1 %vm2173_vm14, %v1364_v20  ;;  %1508 = vmatprep.mubr.msk.bf16.mxu1 %vm1626_vm0, %v1625_v1 }
 0x218   :  { %1509 = vmatmul.mubr.msk.bf16.vlgmr.msra.gmra.mrb[32].mxu1 %vm82_vm4, %v1623_v21 }
 0x2cb   :  { %v742_v22 = vpop.f32.mrb[16].mxu1  ;;  %v791_v23 = vpop.f32.mrb[20].mxu0 }
 0x2cc   :  { %v1462_v24 = vpop.f32.mrb[17].mxu1  ;;  %v792_v26 = vadd.f32 %v791_v23, %v742_v22  ;;  %v1468_v28 = vpop.f32.mrb[21].mxu0 }
 0x2cd   :  { %v745_v29 = vpop.f32.mrb[18].mxu1  ;;  %v794_v31 = vpop.f32.mrb[22].mxu0 }
 0x2ce   :  { %v1463_v32 = vpop.f32.mrb[19].mxu1  ;;  %v795_v17 = vadd.f32 %v794_v31, %v745_v29  ;;  %v1469_v33 = vpop.f32.mrb[23].mxu0 }
 0x2d3   :  { %v850_v34 = vpop.f32.mrb[20].mxu1  ;;  %v911_v35 = vpop.f32.mrb[24].mxu0 }
 0x2d4   :  { %v857_v36 = vadd.f32 %v850_v34, %v792_v26  ;;  %v1474_v1 = vpop.f32.mrb[21].mxu1  ;;  %v1480_v37 = vpop.f32.mrb[25].mxu0 }
 0x2d5   :  { %v853_v38 = vpop.f32.mrb[22].mxu1  ;;  %v914_v39 = vpop.f32.mrb[26].mxu0 }
 0x2d6   :  { %v858_v40 = vadd.f32 %v853_v38, %v795_v17  ;;  %v918_v41 = vadd.f32 %v911_v35, %v857_v36  ;;  %v1475_v42 = vpop.f32.mrb[23].mxu1  ;;  %v1481_v43 = vpop.f32.mrb[27].mxu0 }
 0x2d8   :  { %v919_v45 = vadd.f32 %v914_v39, %v858_v40 }
 0x2db   :  { %v968_v46 = vpop.f32.mrb[24].mxu1  ;;  %v1029_v47 = vpop.f32.mrb[28].mxu0 }
 0x2dc   :  { %v975_v48 = vadd.f32 %v968_v46, %v918_v41  ;;  %v1486_v49 = vpop.f32.mrb[25].mxu1  ;;  %v1492_v50 = vpop.f32.mrb[29].mxu0 }
 0x2dd   :  { %v971_v51 = vpop.f32.mrb[26].mxu1  ;;  %v1032_v52 = vpop.f32.mrb[30].mxu0 }
 0x2de   :  { %v976_v53 = vadd.f32 %v971_v51, %v919_v45  ;;  %v1036_v55 = vadd.f32 %v1029_v47, %v975_v48  ;;  %v1487_v56 = vpop.f32.mrb[27].mxu1  ;;  %v1493_v57 = vpop.f32.mrb[31].mxu0 }
 0x2e0   :  { %v1037_v58 = vadd.f32 %v1032_v52, %v976_v53 }
 0x2e3   :  { %v1090_v59 = vpop.f32.mrb[28].mxu1  ;;  %v1151_v60 = vpop.f32.mrb[32].mxu0 }
 0x2e4   :  { %v1097_v61 = vadd.f32 %v1090_v59, %v1036_v55  ;;  %v1498_v63 = vpop.f32.mrb[29].mxu1  ;;  %v1504_v5 = vpop.f32.mrb[33].mxu0 }
 0x2e5   :  { %v1093_v25 = vpop.f32.mrb[30].mxu1  ;;  %v1154_v27 = vpop.f32.mrb[34].mxu0 }
 0x2e6   :  { %v1098_v30 = vadd.f32 %v1093_v25, %v1037_v58  ;;  %v1158_v44 = vadd.f32 %v1151_v60, %v1097_v61  ;;  %v1499_v6 = vpop.f32.mrb[31].mxu1  ;;  %v1505_v7 = vpop.f32.mrb[35].mxu0 }
 0x2e8   :  { %v1159_v8 = vadd.f32 %v1154_v27, %v1098_v30 }
 0x2eb   :  { %v1212_v9 = vpop.f32.mrb[32].mxu1 }
 0x2ec   :  { %v1219_v10 = vadd.f32 %v1212_v9, %v1158_v44  ;;  %v1510_v12 = vpop.f32.mrb[33].mxu1 }
 0x2ed   :  { %v1215_v54 = vpop.f32.mrb[34].mxu1 }
 0x2ee   :  { %v1233_v62 = vadd.f32 %v1226_v13, %v1219_v10  ;;  %v1220_v14 = vadd.f32 %v1215_v54, %v1159_v8  ;;  %v1511_v15 = vpop.f32.mrb[35].mxu1 }
 0x2f0   :  { %v1235_v18 = vadd.f32 %v1233_v62, %v31_v2  ;;  %v1234_v19 = vadd.f32 %v1231_v16, %v1220_v14 }
 0x2f2   :  { %v1237_v11 = vmax.f32 %v1235_v18, 0.0  ;;  %v1236_v4 = vadd.f32 %v1234_v19, %v32_v3 }
 0x2f4   :  { %1239 = vst [vmem:[%s2127_s7] sm:$0xff] %v1237_v11  ;;  %v1238_v20 = vmax.f32 %v1236_v4, 0.0 }
 0x2f6   :  { %1240 = vst [vmem:[%s2127_s7 + $0x8] sm:$0xff] %v1238_v20 }

</bundles_post_ra>
